<compile_context>
chip_gen: v7x
topology: tpu7x:2x2x1
jax: 0.10.0
libtpu: 0.0.40
codegen_flags: <defaults>
</compile_context>

<pallas_src>
import math
import functools

import jax
import jax.numpy as jnp
from jax.experimental import pallas as pl
from jax.experimental.pallas import tpu as pltpu


# ----------------------------- in-kernel helpers -----------------------------

def _add_layer_norm(x, resid, g, b, eps=1e-5):
    """LayerNorm(x + resid), two-pass centered variance (matches nn.LayerNorm), f32."""
    s = x + resid
    mu = jnp.mean(s, axis=-1, keepdims=True)
    c = s - mu
    var = jnp.mean(c * c, axis=-1, keepdims=True)
    return c * jax.lax.rsqrt(var + eps) * g + b


# --------------------------------- the kernel --------------------------------

def decoder_layer_kernel(
    tgt_ref, mem_ref,
    sa_wqkvT, sa_bqkv, sa_woT, sa_bo,
    ca_wqT, ca_bq, ca_wkvT, ca_bkv, ca_woT, ca_bo,
    w1T, b1, w2T, b2,
    g1, be1, g2, be2, g3, be3,
    out_ref,
    *, nhead, compute_dtype,
):
    B, S_t, D = tgt_ref.shape
    S_m = mem_ref.shape[1]
    hd = D // nhead
    cdt = jnp.dtype(compute_dtype)
    approx_recip = (cdt == jnp.dtype(jnp.bfloat16))  # exact softmax denom on f32 path

    x = tgt_ref[...].reshape(B * S_t, D)   # f32 activations, 2-D slab (fat M dim)
    m = mem_ref[...].reshape(B * S_m, D)

    def proj(a2d, w_ref, b_ref):
        # bf16 (or f32) MXU operands, f32 accumulation, f32 bias add (VPU stays f32).
        return jnp.dot(a2d.astype(cdt), w_ref[...],
                       preferred_element_type=jnp.float32) + b_ref[...]

    def mha(q2d, kv2d, S_k, wo_ref, bo_ref):
        """Multi-head attention.
        q2d: (B*S_t, D) pre-projected queries (1/sqrt(hd) already folded into weights).
        kv2d: (B*S_k, 2D) pre-projected [k | v]."""
        q3 = q2d.reshape(B, S_t, D).astype(cdt)
        kv3 = kv2d.reshape(B, S_k, 2 * D)
        k3 = kv3[:, :, :D].astype(cdt)
        v3 = kv3[:, :, D:].astype(cdt)
        heads = []
        # TODO(synk): for large nhead fold heads into a dot_general batch dim (or a grid
        # axis) instead of this static loop; at nhead=4 it is negligible.
        for h in range(nhead):
            lo, hi = h * hd, (h + 1) * hd
            s = jnp.einsum("bqh,bkh->bqk", q3[:, :, lo:hi], k3[:, :, lo:hi],
                           preferred_element_type=jnp.float32)        # bf16 MXU, f32 acc
            s = s - jnp.max(s, axis=-1, keepdims=True)
            p = jnp.exp(s)                                            # f32 EUP
            denom = jnp.sum(p, axis=-1, keepdims=True)
            if approx_recip:
                p = p * pl.reciprocal(denom, approx=True)             # EUP slot (bf16 path)
            else:
                p = p / denom                                         # exact (f32 path)
            heads.append(jnp.einsum("bqk,bkh->bqh", p.astype(cdt), v3[:, :, lo:hi],
                                    preferred_element_type=jnp.float32))
        # Lane-dense assembly as a value: no masked sub-lane stores, no scratch
        # store->load round trip before the output projection.
        o = jnp.concatenate(heads, axis=-1).reshape(B * S_t, D)
        return proj(o, wo_ref, bo_ref)

    # ---- self-attention + add & norm1 ----
    qkv = proj(x, sa_wqkvT, sa_bqkv)                                  # (B*S_t, 3D)
    sa = mha(qkv[:, :D], qkv[:, D:], S_t, sa_woT, sa_bo)              # (B*S_t, D)
    x1 = _add_layer_norm(x, sa, g1[...], be1[...])

    # ---- cross-attention + add & norm2 ----
    qc = proj(x1, ca_wqT, ca_bq)                                      # (B*S_t, D)
    kv = proj(m, ca_wkvT, ca_bkv)                                     # (B*S_m, 2D)
    ca = mha(qc, kv, S_m, ca_woT, ca_bo)
    x2 = _add_layer_norm(x1, ca, g2[...], be2[...])

    # ---- feed-forward + add & norm3 ----
    hid = jnp.maximum(proj(x2, w1T, b1), 0.0)                         # ReLU
    ff = proj(hid, w2T, b2)
    out_ref[...] = _add_layer_norm(x2, ff, g3[...], be3[...]).reshape(B, S_t, D)


# --------------------------------- wrapper ------------------------------------

def run_decoder_layer(tgt, memory, kp, nhead):
    B, S_t, D = tgt.shape
    S_m = memory.shape[1]
    F = kp["w1T"].shape[1]
    compute_dtype = kp["sa_wqkvT"].dtype

    weight_args = [kp[k] for k in (
        "sa_wqkvT", "sa_bqkv", "sa_woT", "sa_bo",
        "ca_wqT", "ca_bq", "ca_wkvT", "ca_bkv", "ca_woT", "ca_bo",
        "w1T", "b1", "w2T", "b2",
        "g1", "be1", "g2", "be2", "g3", "be3")]

    def full_spec(a):
        # Grid-invariant operand, full-array block.  With the single-step grid there is
        # no double-buffering waste to speak of; for a multi-step grid at production
        # sizes, single-buffer these (pipeline_mode=pl.Buffered(1)) / K-tile the FFN
        # weights so v7x's 64 MiB VMEM is not exhausted.
        return pl.BlockSpec(a.shape, lambda i, _n=a.ndim: (0,) * _n)

    in_specs = [
        pl.BlockSpec((B, S_t, D), lambda i: (0, 0, 0)),
        pl.BlockSpec((B, S_m, D), lambda i: (0, 0, 0)),
    ] + [full_spec(a) for a in weight_args]

    # ---- advisory cost estimate for XLA's scheduler ----
    BSt, BSm = B * S_t, B * S_m
    flops = (
        2 * BSt * D * (3 * D)           # fused self-attn QKV projection
        + 4 * B * S_t * S_t * D         # self-attn scores + PV (all heads)
        + 2 * BSt * D * D               # self-attn output projection
        + 2 * BSt * D * D               # cross-attn Q projection
        + 2 * BSm * D * (2 * D)         # cross-attn fused KV projection
        + 4 * B * S_t * S_m * D         # cross-attn scores + PV
        + 2 * BSt * D * D               # cross-attn output projection
        + 2 * BSt * D * F + 2 * BSt * F * D   # FFN
    )
    cost = pl.CostEstimate(
        flops=int(flops),
        transcendentals=int(B * nhead * (S_t * S_t + S_t * S_m) + 3 * BSt),
        bytes_accessed=int(tgt.nbytes + memory.nbytes
                           + sum(int(a.nbytes) for a in weight_args)
                           + BSt * D * 4),
    )

    # ---- per-generation VMEM limit (headroom below physical capacity) ----
    try:
        vmem_cap = int(pltpu.get_tpu_info().vmem_capacity_bytes)
    except Exception:
        vmem_cap = 64 * 1024 * 1024
    vmem_limit = max(32 * 1024 * 1024, (vmem_cap * 3) // 4)   # ~96 MiB v5e/v6e, ~48 MiB v7x

    return pl.pallas_call(
        functools.partial(decoder_layer_kernel, nhead=nhead,
                          compute_dtype=compute_dtype),
        out_shape=jax.ShapeDtypeStruct((B, S_t, D), jnp.float32),
        grid=(1,),
        in_specs=in_specs,
        out_specs=pl.BlockSpec((B, S_t, D), lambda i: (0, 0, 0)),
        compiler_params=pltpu.CompilerParams(
            dimension_semantics=("arbitrary",),
            vmem_limit_bytes=vmem_limit),
        cost_estimate=cost,
    )(tgt, memory, *weight_args)


# ------------------------- parameter setup (plain JAX) ------------------------

def make_params(key, d_model, nhead, dim_ff):
    ks = jax.random.split(key, 12)
    s = 0.05
    n = lambda k, shp: jax.random.normal(k, shp, jnp.float32) * s
    return dict(
        sa_in_w=n(ks[0], (3 * d_model, d_model)), sa_in_b=n(ks[1], (3 * d_model,)),
        sa_out_w=n(ks[2], (d_model, d_model)),    sa_out_b=n(ks[3], (d_model,)),
        ca_in_w=n(ks[4], (3 * d_model, d_model)), ca_in_b=n(ks[5], (3 * d_model,)),
        ca_out_w=n(ks[6], (d_model, d_model)),    ca_out_b=n(ks[7], (d_model,)),
        w1=n(ks[8], (dim_ff, d_model)),  b1=n(ks[9], (dim_ff,)),
        w2=n(ks[10], (d_model, dim_ff)), b2=n(ks[11], (d_model,)),
        g1=jnp.ones((d_model,), jnp.float32), be1=jnp.zeros((d_model,), jnp.float32),
        g2=jnp.ones((d_model,), jnp.float32), be2=jnp.zeros((d_model,), jnp.float32),
        g3=jnp.ones((d_model,), jnp.float32), be3=jnp.zeros((d_model,), jnp.float32),
    )


def to_kernel_params(p, d_model, nhead, compute_dtype=jnp.float32):
    """Pre-transpose / fuse weights for full-width matmuls inside the kernel.

    PyTorch MultiheadAttention: in_proj_weight is (3D, D) with rows [Wq; Wk; Wv];
    q = x @ Wq^T + bq.  The 1/sqrt(head_dim) softmax scale is folded into the Q rows of
    the in-projection (weights AND bias) so the kernel needs no score rescale.
    Matmul weights are cast to `compute_dtype`; biases / LN params stay f32.
    """
    D = d_model
    hd = D // nhead
    scale = 1.0 / math.sqrt(hd)
    cdt = compute_dtype
    r2 = lambda v: v.reshape(1, -1)

    sa_w = p["sa_in_w"].at[:D].multiply(scale)     # scale Q rows
    sa_b = p["sa_in_b"].at[:D].multiply(scale)
    return dict(
        sa_wqkvT=sa_w.T.astype(cdt),                          # (D, 3D), Q cols pre-scaled
        sa_bqkv=r2(sa_b),                                     # (1, 3D) f32
        sa_woT=p["sa_out_w"].T.astype(cdt),                   # (D, D)
        sa_bo=r2(p["sa_out_b"]),
        ca_wqT=(p["ca_in_w"][:D] * scale).T.astype(cdt),      # (D, D), pre-scaled
        ca_bq=r2(p["ca_in_b"][:D] * scale),
        ca_wkvT=p["ca_in_w"][D:].T.astype(cdt),               # (D, 2D)
        ca_bkv=r2(p["ca_in_b"][D:]),
        ca_woT=p["ca_out_w"].T.astype(cdt),
        ca_bo=r2(p["ca_out_b"]),
        w1T=p["w1"].T.astype(cdt), b1=r2(p["b1"]),
        w2T=p["w2"].T.astype(cdt), b2=r2(p["b2"]),
        g1=r2(p["g1"]), be1=r2(p["be1"]),
        g2=r2(p["g2"]), be2=r2(p["be2"]),
        g3=r2(p["g3"]), be3=r2(p["be3"]),
    )


# ------------------------- pure-JAX reference (check) --------------------------

def _mha_ref(q_in, kv_in, in_w, in_b, out_w, out_b, nhead):
    B, Sq, D = q_in.shape
    Sk = kv_in.shape[1]
    hd = D // nhead
    q = q_in @ in_w[:D].T + in_b[:D]
    k = kv_in @ in_w[D:2 * D].T + in_b[D:2 * D]
    v = kv_in @ in_w[2 * D:].T + in_b[2 * D:]
    split = lambda x, S: x.reshape(B, S, nhead, hd).transpose(0, 2, 1, 3)
    qh, kh, vh = split(q, Sq), split(k, Sk), split(v, Sk)
    s = jnp.einsum("bhqd,bhkd->bhqk", qh, kh) / math.sqrt(hd)
    p = jax.nn.softmax(s, axis=-1)
    o = jnp.einsum("bhqk,bhkd->bhqd", p, vh)
    o = o.transpose(0, 2, 1, 3).reshape(B, Sq, D)
    return o @ out_w.T + out_b


def _ln_ref(x, g, b, eps=1e-5):
    mu = x.mean(-1, keepdims=True)
    var = jnp.square(x - mu).mean(-1, keepdims=True)
    return (x - mu) * jax.lax.rsqrt(var + eps) * g + b


def decoder_layer_ref(tgt, memory, p, nhead):
    x = _ln_ref(tgt + _mha_ref(tgt, tgt, p["sa_in_w"], p["sa_in_b"],
                               p["sa_out_w"], p["sa_out_b"], nhead), p["g1"], p["be1"])
    x = _ln_ref(x + _mha_ref(x, memory, p["ca_in_w"], p["ca_in_b"],
                             p["ca_out_w"], p["ca_out_b"], nhead), p["g2"], p["be2"])
    ff = jnp.maximum(x @ p["w1"].T + p["b1"], 0.0) @ p["w2"].T + p["b2"]
    return _ln_ref(x + ff, p["g3"], p["be3"])


# ----------------------------------- main --------------------------------------

if __name__ == "__main__":
    d_model, nhead, dim_feedforward, dropout = 32, 4, 64, 0.1  # dropout is identity (eval)
    B, S_t, S_m = 2, 8, 16

    key = jax.random.PRNGKey(0)
    k_tgt, k_mem, k_par = jax.random.split(key, 3)
    tgt = jax.random.normal(k_tgt, (B, S_t, d_model), jnp.float32)
    memory = jax.random.normal(k_mem, (B, S_m, d_model), jnp.float32)

    params = make_params(k_par, d_model, nhead, dim_feedforward)
    ref = decoder_layer_ref(tgt, memory, params, nhead)

    # f32 path (exact softmax denom) and bf16-MXU path (approx EUP reciprocal).
    for cdt, tol in ((jnp.float32, 1e-3), (jnp.bfloat16, 5e-2)):
        kparams = to_kernel_params(params, d_model, nhead, compute_dtype=cdt)
        out = jax.block_until_ready(run_decoder_layer(tgt, memory, kparams, nhead))
        assert out.shape == (B, S_t, d_model) and out.dtype == jnp.float32
        if not bool(jnp.allclose(out, ref, atol=tol, rtol=tol)):
            raise SystemExit(
                f"mismatch vs reference ({jnp.dtype(cdt).name}), "
                f"max_err={float(jnp.max(jnp.abs(out - ref)))}")

    print("KERNEL_OK")
</pallas_src>

<mosaic_0001>
module attributes {stable_mosaic.version = 11 : i64} {
  func.func @decoder_layer_kernel(%arg0: i32, %arg1: memref<2x8x32xf32, #tpu.memory_space<vmem>>, %arg2: memref<2x16x32xf32, #tpu.memory_space<vmem>>, %arg3: memref<32x96xf32, #tpu.memory_space<vmem>>, %arg4: memref<1x96xf32, #tpu.memory_space<vmem>>, %arg5: memref<32x32xf32, #tpu.memory_space<vmem>>, %arg6: memref<1x32xf32, #tpu.memory_space<vmem>>, %arg7: memref<32x32xf32, #tpu.memory_space<vmem>>, %arg8: memref<1x32xf32, #tpu.memory_space<vmem>>, %arg9: memref<32x64xf32, #tpu.memory_space<vmem>>, %arg10: memref<1x64xf32, #tpu.memory_space<vmem>>, %arg11: memref<32x32xf32, #tpu.memory_space<vmem>>, %arg12: memref<1x32xf32, #tpu.memory_space<vmem>>, %arg13: memref<32x64xf32, #tpu.memory_space<vmem>>, %arg14: memref<1x64xf32, #tpu.memory_space<vmem>>, %arg15: memref<64x32xf32, #tpu.memory_space<vmem>>, %arg16: memref<1x32xf32, #tpu.memory_space<vmem>>, %arg17: memref<1x32xf32, #tpu.memory_space<vmem>>, %arg18: memref<1x32xf32, #tpu.memory_space<vmem>>, %arg19: memref<1x32xf32, #tpu.memory_space<vmem>>, %arg20: memref<1x32xf32, #tpu.memory_space<vmem>>, %arg21: memref<1x32xf32, #tpu.memory_space<vmem>>, %arg22: memref<1x32xf32, #tpu.memory_space<vmem>>, %arg23: memref<2x8x32xf32, #tpu.memory_space<vmem>>) attributes {dimension_semantics = [#tpu.dimension_semantics<arbitrary>], iteration_bounds = array<i64: 1>, scalar_prefetch = 0 : i64, scratch_operands = 0 : i64, tpu.core_type = #tpu.core_type<tc>, window_params = [{pipeline_mode = #tpu.pipeline_mode<synchronous>, transform_indices = @transform_0, window_bounds = array<i64: 2, 8, 32>}, {pipeline_mode = #tpu.pipeline_mode<synchronous>, transform_indices = @transform_1, window_bounds = array<i64: 2, 16, 32>}, {pipeline_mode = #tpu.pipeline_mode<synchronous>, transform_indices = @transform_2, window_bounds = array<i64: 32, 96>}, {pipeline_mode = #tpu.pipeline_mode<synchronous>, transform_indices = @transform_3, window_bounds = array<i64: 1, 96>}, {pipeline_mode = #tpu.pipeline_mode<synchronous>, transform_indices = @transform_4, window_bounds = array<i64: 32, 32>}, {pipeline_mode = #tpu.pipeline_mode<synchronous>, transform_indices = @transform_5, window_bounds = array<i64: 1, 32>}, {pipeline_mode = #tpu.pipeline_mode<synchronous>, transform_indices = @transform_6, window_bounds = array<i64: 32, 32>}, {pipeline_mode = #tpu.pipeline_mode<synchronous>, transform_indices = @transform_7, window_bounds = array<i64: 1, 32>}, {pipeline_mode = #tpu.pipeline_mode<synchronous>, transform_indices = @transform_8, window_bounds = array<i64: 32, 64>}, {pipeline_mode = #tpu.pipeline_mode<synchronous>, transform_indices = @transform_9, window_bounds = array<i64: 1, 64>}, {pipeline_mode = #tpu.pipeline_mode<synchronous>, transform_indices = @transform_10, window_bounds = array<i64: 32, 32>}, {pipeline_mode = #tpu.pipeline_mode<synchronous>, transform_indices = @transform_11, window_bounds = array<i64: 1, 32>}, {pipeline_mode = #tpu.pipeline_mode<synchronous>, transform_indices = @transform_12, window_bounds = array<i64: 32, 64>}, {pipeline_mode = #tpu.pipeline_mode<synchronous>, transform_indices = @transform_13, window_bounds = array<i64: 1, 64>}, {pipeline_mode = #tpu.pipeline_mode<synchronous>, transform_indices = @transform_14, window_bounds = array<i64: 64, 32>}, {pipeline_mode = #tpu.pipeline_mode<synchronous>, transform_indices = @transform_15, window_bounds = array<i64: 1, 32>}, {pipeline_mode = #tpu.pipeline_mode<synchronous>, transform_indices = @transform_16, window_bounds = array<i64: 1, 32>}, {pipeline_mode = #tpu.pipeline_mode<synchronous>, transform_indices = @transform_17, window_bounds = array<i64: 1, 32>}, {pipeline_mode = #tpu.pipeline_mode<synchronous>, transform_indices = @transform_18, window_bounds = array<i64: 1, 32>}, {pipeline_mode = #tpu.pipeline_mode<synchronous>, transform_indices = @transform_19, window_bounds = array<i64: 1, 32>}, {pipeline_mode = #tpu.pipeline_mode<synchronous>, transform_indices = @transform_20, window_bounds = array<i64: 1, 32>}, {pipeline_mode = #tpu.pipeline_mode<synchronous>, transform_indices = @transform_21, window_bounds = array<i64: 1, 32>}, {pipeline_mode = #tpu.pipeline_mode<synchronous>, transform_indices = @transform_22, window_bounds = array<i64: 2, 8, 32>}]} {
    %c0 = arith.constant 0 : index
    %c0_0 = arith.constant 0 : index
    %c0_1 = arith.constant 0 : index
    %0 = vector.load %arg1[%c0, %c0_0, %c0_1] : memref<2x8x32xf32, #tpu.memory_space<vmem>>, vector<2x8x32xf32>
    %1 = vector.shape_cast %0 : vector<2x8x32xf32> to vector<16x32xf32>
    %c0_2 = arith.constant 0 : index
    %c0_3 = arith.constant 0 : index
    %c0_4 = arith.constant 0 : index
    %2 = vector.load %arg2[%c0_2, %c0_3, %c0_4] : memref<2x16x32xf32, #tpu.memory_space<vmem>>, vector<2x16x32xf32>
    %3 = vector.shape_cast %2 : vector<2x16x32xf32> to vector<32x32xf32>
    %c0_5 = arith.constant 0 : index
    %c0_6 = arith.constant 0 : index
    %4 = vector.load %arg3[%c0_5, %c0_6] : memref<32x96xf32, #tpu.memory_space<vmem>>, vector<32x96xf32>
    %cst = arith.constant dense<0.000000e+00> : vector<16x96xf32>
    %5 = tpu.matmul %1, %4, %cst {dimension_numbers = #tpu.dot_dimension_numbers<[1], [0], [0], [1], [0, 0, 1, 1], [], []>} : vector<16x32xf32>, vector<32x96xf32>, vector<16x96xf32> -> vector<16x96xf32>
    %c0_7 = arith.constant 0 : index
    %c0_8 = arith.constant 0 : index
    %6 = vector.load %arg4[%c0_7, %c0_8] : memref<1x96xf32, #tpu.memory_space<vmem>>, vector<1x96xf32>
    %7 = vector.broadcast %6 : vector<1x96xf32> to vector<16x96xf32>
    %8 = arith.addf %5, %7 : vector<16x96xf32>
    %9 = vector.extract_strided_slice %8 {offsets = [0, 0], sizes = [16, 32], strides = [1, 1]} : vector<16x96xf32> to vector<16x32xf32>
    %10 = vector.extract_strided_slice %8 {offsets = [0, 32], sizes = [16, 64], strides = [1, 1]} : vector<16x96xf32> to vector<16x64xf32>
    %11 = vector.shape_cast %9 : vector<16x32xf32> to vector<2x8x32xf32>
    %12 = vector.shape_cast %10 : vector<16x64xf32> to vector<2x8x64xf32>
    %13 = vector.extract_strided_slice %12 {offsets = [0, 0, 0], sizes = [2, 8, 32], strides = [1, 1, 1]} : vector<2x8x64xf32> to vector<2x8x32xf32>
    %14 = vector.extract_strided_slice %12 {offsets = [0, 0, 32], sizes = [2, 8, 32], strides = [1, 1, 1]} : vector<2x8x64xf32> to vector<2x8x32xf32>
    %15 = vector.extract_strided_slice %11 {offsets = [0, 0, 0], sizes = [2, 8, 8], strides = [1, 1, 1]} : vector<2x8x32xf32> to vector<2x8x8xf32>
    %16 = vector.extract_strided_slice %13 {offsets = [0, 0, 0], sizes = [2, 8, 8], strides = [1, 1, 1]} : vector<2x8x32xf32> to vector<2x8x8xf32>
    "tpu.trace_start"() <{level = 10 : i32, message = "bqh,bkh->bqk"}> : () -> ()
    %cst_9 = arith.constant dense<0.000000e+00> : vector<2x8x8xf32>
    %17 = tpu.matmul %15, %16, %cst_9 {dimension_numbers = #tpu.dot_dimension_numbers<[2], [2], [1], [1], [0, 0, 0, 1, 1, 1], [0], [0]>} : vector<2x8x8xf32>, vector<2x8x8xf32>, vector<2x8x8xf32> -> vector<2x8x8xf32>
    "tpu.trace_stop"() : () -> ()
    %cst_10 = arith.constant dense<0xFF800000> : vector<2x8xf32>
    %18 = vector.multi_reduction <maximumf>, %17, %cst_10 [2] : vector<2x8x8xf32> to vector<2x8xf32>
    %19 = vector.shape_cast %18 : vector<2x8xf32> to vector<2x8x1xf32>
    %20 = vector.broadcast %19 : vector<2x8x1xf32> to vector<2x8x8xf32>
    %21 = arith.subf %17, %20 : vector<2x8x8xf32>
    %22 = math.exp %21 : vector<2x8x8xf32>
    %cst_11 = arith.constant dense<0.000000e+00> : vector<2x8xf32>
    %23 = vector.multi_reduction <add>, %22, %cst_11 [2] : vector<2x8x8xf32> to vector<2x8xf32>
    %24 = vector.shape_cast %23 : vector<2x8xf32> to vector<2x8x1xf32>
    %25 = vector.broadcast %24 : vector<2x8x1xf32> to vector<2x8x8xf32>
    %26 = arith.divf %22, %25 : vector<2x8x8xf32>
    %27 = vector.extract_strided_slice %14 {offsets = [0, 0, 0], sizes = [2, 8, 8], strides = [1, 1, 1]} : vector<2x8x32xf32> to vector<2x8x8xf32>
    "tpu.trace_start"() <{level = 10 : i32, message = "bqk,bkh->bqh"}> : () -> ()
    %cst_12 = arith.constant dense<0.000000e+00> : vector<2x8x8xf32>
    %28 = tpu.matmul %26, %27, %cst_12 {dimension_numbers = #tpu.dot_dimension_numbers<[2], [1], [1], [2], [0, 0, 0, 1, 1, 2], [0], [0]>} : vector<2x8x8xf32>, vector<2x8x8xf32>, vector<2x8x8xf32> -> vector<2x8x8xf32>
    "tpu.trace_stop"() : () -> ()
    %29 = vector.extract_strided_slice %11 {offsets = [0, 0, 8], sizes = [2, 8, 8], strides = [1, 1, 1]} : vector<2x8x32xf32> to vector<2x8x8xf32>
    %30 = vector.extract_strided_slice %13 {offsets = [0, 0, 8], sizes = [2, 8, 8], strides = [1, 1, 1]} : vector<2x8x32xf32> to vector<2x8x8xf32>
    "tpu.trace_start"() <{level = 10 : i32, message = "bqh,bkh->bqk"}> : () -> ()
    %cst_13 = arith.constant dense<0.000000e+00> : vector<2x8x8xf32>
    %31 = tpu.matmul %29, %30, %cst_13 {dimension_numbers = #tpu.dot_dimension_numbers<[2], [2], [1], [1], [0, 0, 0, 1, 1, 1], [0], [0]>} : vector<2x8x8xf32>, vector<2x8x8xf32>, vector<2x8x8xf32> -> vector<2x8x8xf32>
    "tpu.trace_stop"() : () -> ()
    %cst_14 = arith.constant dense<0xFF800000> : vector<2x8xf32>
    %32 = vector.multi_reduction <maximumf>, %31, %cst_14 [2] : vector<2x8x8xf32> to vector<2x8xf32>
    %33 = vector.shape_cast %32 : vector<2x8xf32> to vector<2x8x1xf32>
    %34 = vector.broadcast %33 : vector<2x8x1xf32> to vector<2x8x8xf32>
    %35 = arith.subf %31, %34 : vector<2x8x8xf32>
    %36 = math.exp %35 : vector<2x8x8xf32>
    %cst_15 = arith.constant dense<0.000000e+00> : vector<2x8xf32>
    %37 = vector.multi_reduction <add>, %36, %cst_15 [2] : vector<2x8x8xf32> to vector<2x8xf32>
    %38 = vector.shape_cast %37 : vector<2x8xf32> to vector<2x8x1xf32>
    %39 = vector.broadcast %38 : vector<2x8x1xf32> to vector<2x8x8xf32>
    %40 = arith.divf %36, %39 : vector<2x8x8xf32>
    %41 = vector.extract_strided_slice %14 {offsets = [0, 0, 8], sizes = [2, 8, 8], strides = [1, 1, 1]} : vector<2x8x32xf32> to vector<2x8x8xf32>
    "tpu.trace_start"() <{level = 10 : i32, message = "bqk,bkh->bqh"}> : () -> ()
    %cst_16 = arith.constant dense<0.000000e+00> : vector<2x8x8xf32>
    %42 = tpu.matmul %40, %41, %cst_16 {dimension_numbers = #tpu.dot_dimension_numbers<[2], [1], [1], [2], [0, 0, 0, 1, 1, 2], [0], [0]>} : vector<2x8x8xf32>, vector<2x8x8xf32>, vector<2x8x8xf32> -> vector<2x8x8xf32>
    "tpu.trace_stop"() : () -> ()
    %43 = vector.extract_strided_slice %11 {offsets = [0, 0, 16], sizes = [2, 8, 8], strides = [1, 1, 1]} : vector<2x8x32xf32> to vector<2x8x8xf32>
    %44 = vector.extract_strided_slice %13 {offsets = [0, 0, 16], sizes = [2, 8, 8], strides = [1, 1, 1]} : vector<2x8x32xf32> to vector<2x8x8xf32>
    "tpu.trace_start"() <{level = 10 : i32, message = "bqh,bkh->bqk"}> : () -> ()
    %cst_17 = arith.constant dense<0.000000e+00> : vector<2x8x8xf32>
    %45 = tpu.matmul %43, %44, %cst_17 {dimension_numbers = #tpu.dot_dimension_numbers<[2], [2], [1], [1], [0, 0, 0, 1, 1, 1], [0], [0]>} : vector<2x8x8xf32>, vector<2x8x8xf32>, vector<2x8x8xf32> -> vector<2x8x8xf32>
    "tpu.trace_stop"() : () -> ()
    %cst_18 = arith.constant dense<0xFF800000> : vector<2x8xf32>
    %46 = vector.multi_reduction <maximumf>, %45, %cst_18 [2] : vector<2x8x8xf32> to vector<2x8xf32>
    %47 = vector.shape_cast %46 : vector<2x8xf32> to vector<2x8x1xf32>
    %48 = vector.broadcast %47 : vector<2x8x1xf32> to vector<2x8x8xf32>
    %49 = arith.subf %45, %48 : vector<2x8x8xf32>
    %50 = math.exp %49 : vector<2x8x8xf32>
    %cst_19 = arith.constant dense<0.000000e+00> : vector<2x8xf32>
    %51 = vector.multi_reduction <add>, %50, %cst_19 [2] : vector<2x8x8xf32> to vector<2x8xf32>
    %52 = vector.shape_cast %51 : vector<2x8xf32> to vector<2x8x1xf32>
    %53 = vector.broadcast %52 : vector<2x8x1xf32> to vector<2x8x8xf32>
    %54 = arith.divf %50, %53 : vector<2x8x8xf32>
    %55 = vector.extract_strided_slice %14 {offsets = [0, 0, 16], sizes = [2, 8, 8], strides = [1, 1, 1]} : vector<2x8x32xf32> to vector<2x8x8xf32>
    "tpu.trace_start"() <{level = 10 : i32, message = "bqk,bkh->bqh"}> : () -> ()
    %cst_20 = arith.constant dense<0.000000e+00> : vector<2x8x8xf32>
    %56 = tpu.matmul %54, %55, %cst_20 {dimension_numbers = #tpu.dot_dimension_numbers<[2], [1], [1], [2], [0, 0, 0, 1, 1, 2], [0], [0]>} : vector<2x8x8xf32>, vector<2x8x8xf32>, vector<2x8x8xf32> -> vector<2x8x8xf32>
    "tpu.trace_stop"() : () -> ()
    %57 = vector.extract_strided_slice %11 {offsets = [0, 0, 24], sizes = [2, 8, 8], strides = [1, 1, 1]} : vector<2x8x32xf32> to vector<2x8x8xf32>
    %58 = vector.extract_strided_slice %13 {offsets = [0, 0, 24], sizes = [2, 8, 8], strides = [1, 1, 1]} : vector<2x8x32xf32> to vector<2x8x8xf32>
    "tpu.trace_start"() <{level = 10 : i32, message = "bqh,bkh->bqk"}> : () -> ()
    %cst_21 = arith.constant dense<0.000000e+00> : vector<2x8x8xf32>
    %59 = tpu.matmul %57, %58, %cst_21 {dimension_numbers = #tpu.dot_dimension_numbers<[2], [2], [1], [1], [0, 0, 0, 1, 1, 1], [0], [0]>} : vector<2x8x8xf32>, vector<2x8x8xf32>, vector<2x8x8xf32> -> vector<2x8x8xf32>
    "tpu.trace_stop"() : () -> ()
    %cst_22 = arith.constant dense<0xFF800000> : vector<2x8xf32>
    %60 = vector.multi_reduction <maximumf>, %59, %cst_22 [2] : vector<2x8x8xf32> to vector<2x8xf32>
    %61 = vector.shape_cast %60 : vector<2x8xf32> to vector<2x8x1xf32>
    %62 = vector.broadcast %61 : vector<2x8x1xf32> to vector<2x8x8xf32>
    %63 = arith.subf %59, %62 : vector<2x8x8xf32>
    %64 = math.exp %63 : vector<2x8x8xf32>
    %cst_23 = arith.constant dense<0.000000e+00> : vector<2x8xf32>
    %65 = vector.multi_reduction <add>, %64, %cst_23 [2] : vector<2x8x8xf32> to vector<2x8xf32>
    %66 = vector.shape_cast %65 : vector<2x8xf32> to vector<2x8x1xf32>
    %67 = vector.broadcast %66 : vector<2x8x1xf32> to vector<2x8x8xf32>
    %68 = arith.divf %64, %67 : vector<2x8x8xf32>
    %69 = vector.extract_strided_slice %14 {offsets = [0, 0, 24], sizes = [2, 8, 8], strides = [1, 1, 1]} : vector<2x8x32xf32> to vector<2x8x8xf32>
    "tpu.trace_start"() <{level = 10 : i32, message = "bqk,bkh->bqh"}> : () -> ()
    %cst_24 = arith.constant dense<0.000000e+00> : vector<2x8x8xf32>
    %70 = tpu.matmul %68, %69, %cst_24 {dimension_numbers = #tpu.dot_dimension_numbers<[2], [1], [1], [2], [0, 0, 0, 1, 1, 2], [0], [0]>} : vector<2x8x8xf32>, vector<2x8x8xf32>, vector<2x8x8xf32> -> vector<2x8x8xf32>
    "tpu.trace_stop"() : () -> ()
    %71 = tpu.concatenate %28, %42, %56, %70 in 2 : vector<2x8x8xf32>, vector<2x8x8xf32>, vector<2x8x8xf32>, vector<2x8x8xf32> -> vector<2x8x32xf32>
    %72 = vector.shape_cast %71 : vector<2x8x32xf32> to vector<16x32xf32>
    %c0_25 = arith.constant 0 : index
    %c0_26 = arith.constant 0 : index
    %73 = vector.load %arg5[%c0_25, %c0_26] : memref<32x32xf32, #tpu.memory_space<vmem>>, vector<32x32xf32>
    %cst_27 = arith.constant dense<0.000000e+00> : vector<16x32xf32>
    %74 = tpu.matmul %72, %73, %cst_27 {dimension_numbers = #tpu.dot_dimension_numbers<[1], [0], [0], [1], [0, 0, 1, 1], [], []>} : vector<16x32xf32>, vector<32x32xf32>, vector<16x32xf32> -> vector<16x32xf32>
    %c0_28 = arith.constant 0 : index
    %c0_29 = arith.constant 0 : index
    %75 = vector.load %arg6[%c0_28, %c0_29] : memref<1x32xf32, #tpu.memory_space<vmem>>, vector<1x32xf32>
    %76 = vector.broadcast %75 : vector<1x32xf32> to vector<16x32xf32>
    %77 = arith.addf %74, %76 : vector<16x32xf32>
    %c0_30 = arith.constant 0 : index
    %c0_31 = arith.constant 0 : index
    %78 = vector.load %arg17[%c0_30, %c0_31] : memref<1x32xf32, #tpu.memory_space<vmem>>, vector<1x32xf32>
    %c0_32 = arith.constant 0 : index
    %c0_33 = arith.constant 0 : index
    %79 = vector.load %arg18[%c0_32, %c0_33] : memref<1x32xf32, #tpu.memory_space<vmem>>, vector<1x32xf32>
    %80 = arith.addf %1, %77 : vector<16x32xf32>
    %cst_34 = arith.constant dense<0.000000e+00> : vector<16xf32>
    %81 = vector.multi_reduction <add>, %80, %cst_34 [1] : vector<16x32xf32> to vector<16xf32>
    %82 = vector.shape_cast %81 : vector<16xf32> to vector<16x1xf32>
    %cst_35 = arith.constant 3.200000e+01 : f32
    %83 = vector.broadcast %cst_35 : f32 to vector<16x1xf32>
    %84 = arith.divf %82, %83 : vector<16x1xf32>
    %85 = vector.broadcast %84 : vector<16x1xf32> to vector<16x32xf32>
    %86 = arith.subf %80, %85 : vector<16x32xf32>
    %87 = arith.mulf %86, %86 : vector<16x32xf32>
    %cst_36 = arith.constant dense<0.000000e+00> : vector<16xf32>
    %88 = vector.multi_reduction <add>, %87, %cst_36 [1] : vector<16x32xf32> to vector<16xf32>
    %89 = vector.shape_cast %88 : vector<16xf32> to vector<16x1xf32>
    %cst_37 = arith.constant 3.200000e+01 : f32
    %90 = vector.broadcast %cst_37 : f32 to vector<16x1xf32>
    %91 = arith.divf %89, %90 : vector<16x1xf32>
    %cst_38 = arith.constant 9.99999974E-6 : f32
    %92 = vector.broadcast %cst_38 : f32 to vector<16x1xf32>
    %93 = arith.addf %91, %92 : vector<16x1xf32>
    %94 = math.rsqrt %93 : vector<16x1xf32>
    %95 = vector.broadcast %94 : vector<16x1xf32> to vector<16x32xf32>
    %96 = arith.mulf %86, %95 : vector<16x32xf32>
    %97 = vector.broadcast %78 : vector<1x32xf32> to vector<16x32xf32>
    %98 = arith.mulf %96, %97 : vector<16x32xf32>
    %99 = vector.broadcast %79 : vector<1x32xf32> to vector<16x32xf32>
    %100 = arith.addf %98, %99 : vector<16x32xf32>
    %c0_39 = arith.constant 0 : index
    %c0_40 = arith.constant 0 : index
    %101 = vector.load %arg7[%c0_39, %c0_40] : memref<32x32xf32, #tpu.memory_space<vmem>>, vector<32x32xf32>
    %cst_41 = arith.constant dense<0.000000e+00> : vector<16x32xf32>
    %102 = tpu.matmul %100, %101, %cst_41 {dimension_numbers = #tpu.dot_dimension_numbers<[1], [0], [0], [1], [0, 0, 1, 1], [], []>} : vector<16x32xf32>, vector<32x32xf32>, vector<16x32xf32> -> vector<16x32xf32>
    %c0_42 = arith.constant 0 : index
    %c0_43 = arith.constant 0 : index
    %103 = vector.load %arg8[%c0_42, %c0_43] : memref<1x32xf32, #tpu.memory_space<vmem>>, vector<1x32xf32>
    %104 = vector.broadcast %103 : vector<1x32xf32> to vector<16x32xf32>
    %105 = arith.addf %102, %104 : vector<16x32xf32>
    %c0_44 = arith.constant 0 : index
    %c0_45 = arith.constant 0 : index
    %106 = vector.load %arg9[%c0_44, %c0_45] : memref<32x64xf32, #tpu.memory_space<vmem>>, vector<32x64xf32>
    %cst_46 = arith.constant dense<0.000000e+00> : vector<32x64xf32>
    %107 = tpu.matmul %3, %106, %cst_46 {dimension_numbers = #tpu.dot_dimension_numbers<[1], [0], [0], [1], [0, 0, 1, 1], [], []>} : vector<32x32xf32>, vector<32x64xf32>, vector<32x64xf32> -> vector<32x64xf32>
    %c0_47 = arith.constant 0 : index
    %c0_48 = arith.constant 0 : index
    %108 = vector.load %arg10[%c0_47, %c0_48] : memref<1x64xf32, #tpu.memory_space<vmem>>, vector<1x64xf32>
    %109 = vector.broadcast %108 : vector<1x64xf32> to vector<32x64xf32>
    %110 = arith.addf %107, %109 : vector<32x64xf32>
    %111 = vector.shape_cast %105 : vector<16x32xf32> to vector<2x8x32xf32>
    %112 = vector.shape_cast %110 : vector<32x64xf32> to vector<2x16x64xf32>
    %113 = vector.extract_strided_slice %112 {offsets = [0, 0, 0], sizes = [2, 16, 32], strides = [1, 1, 1]} : vector<2x16x64xf32> to vector<2x16x32xf32>
    %114 = vector.extract_strided_slice %112 {offsets = [0, 0, 32], sizes = [2, 16, 32], strides = [1, 1, 1]} : vector<2x16x64xf32> to vector<2x16x32xf32>
    %115 = vector.extract_strided_slice %111 {offsets = [0, 0, 0], sizes = [2, 8, 8], strides = [1, 1, 1]} : vector<2x8x32xf32> to vector<2x8x8xf32>
    %116 = vector.extract_strided_slice %113 {offsets = [0, 0, 0], sizes = [2, 16, 8], strides = [1, 1, 1]} : vector<2x16x32xf32> to vector<2x16x8xf32>
    "tpu.trace_start"() <{level = 10 : i32, message = "bqh,bkh->bqk"}> : () -> ()
    %cst_49 = arith.constant dense<0.000000e+00> : vector<2x8x16xf32>
    %117 = tpu.matmul %115, %116, %cst_49 {dimension_numbers = #tpu.dot_dimension_numbers<[2], [2], [1], [1], [0, 0, 0, 1, 1, 1], [0], [0]>} : vector<2x8x8xf32>, vector<2x16x8xf32>, vector<2x8x16xf32> -> vector<2x8x16xf32>
    "tpu.trace_stop"() : () -> ()
    %cst_50 = arith.constant dense<0xFF800000> : vector<2x8xf32>
    %118 = vector.multi_reduction <maximumf>, %117, %cst_50 [2] : vector<2x8x16xf32> to vector<2x8xf32>
    %119 = vector.shape_cast %118 : vector<2x8xf32> to vector<2x8x1xf32>
    %120 = vector.broadcast %119 : vector<2x8x1xf32> to vector<2x8x16xf32>
    %121 = arith.subf %117, %120 : vector<2x8x16xf32>
    %122 = math.exp %121 : vector<2x8x16xf32>
    %cst_51 = arith.constant dense<0.000000e+00> : vector<2x8xf32>
    %123 = vector.multi_reduction <add>, %122, %cst_51 [2] : vector<2x8x16xf32> to vector<2x8xf32>
    %124 = vector.shape_cast %123 : vector<2x8xf32> to vector<2x8x1xf32>
    %125 = vector.broadcast %124 : vector<2x8x1xf32> to vector<2x8x16xf32>
    %126 = arith.divf %122, %125 : vector<2x8x16xf32>
    %127 = vector.extract_strided_slice %114 {offsets = [0, 0, 0], sizes = [2, 16, 8], strides = [1, 1, 1]} : vector<2x16x32xf32> to vector<2x16x8xf32>
    "tpu.trace_start"() <{level = 10 : i32, message = "bqk,bkh->bqh"}> : () -> ()
    %cst_52 = arith.constant dense<0.000000e+00> : vector<2x8x8xf32>
    %128 = tpu.matmul %126, %127, %cst_52 {dimension_numbers = #tpu.dot_dimension_numbers<[2], [1], [1], [2], [0, 0, 0, 1, 1, 2], [0], [0]>} : vector<2x8x16xf32>, vector<2x16x8xf32>, vector<2x8x8xf32> -> vector<2x8x8xf32>
    "tpu.trace_stop"() : () -> ()
    %129 = vector.extract_strided_slice %111 {offsets = [0, 0, 8], sizes = [2, 8, 8], strides = [1, 1, 1]} : vector<2x8x32xf32> to vector<2x8x8xf32>
    %130 = vector.extract_strided_slice %113 {offsets = [0, 0, 8], sizes = [2, 16, 8], strides = [1, 1, 1]} : vector<2x16x32xf32> to vector<2x16x8xf32>
    "tpu.trace_start"() <{level = 10 : i32, message = "bqh,bkh->bqk"}> : () -> ()
    %cst_53 = arith.constant dense<0.000000e+00> : vector<2x8x16xf32>
    %131 = tpu.matmul %129, %130, %cst_53 {dimension_numbers = #tpu.dot_dimension_numbers<[2], [2], [1], [1], [0, 0, 0, 1, 1, 1], [0], [0]>} : vector<2x8x8xf32>, vector<2x16x8xf32>, vector<2x8x16xf32> -> vector<2x8x16xf32>
    "tpu.trace_stop"() : () -> ()
    %cst_54 = arith.constant dense<0xFF800000> : vector<2x8xf32>
    %132 = vector.multi_reduction <maximumf>, %131, %cst_54 [2] : vector<2x8x16xf32> to vector<2x8xf32>
    %133 = vector.shape_cast %132 : vector<2x8xf32> to vector<2x8x1xf32>
    %134 = vector.broadcast %133 : vector<2x8x1xf32> to vector<2x8x16xf32>
    %135 = arith.subf %131, %134 : vector<2x8x16xf32>
    %136 = math.exp %135 : vector<2x8x16xf32>
    %cst_55 = arith.constant dense<0.000000e+00> : vector<2x8xf32>
    %137 = vector.multi_reduction <add>, %136, %cst_55 [2] : vector<2x8x16xf32> to vector<2x8xf32>
    %138 = vector.shape_cast %137 : vector<2x8xf32> to vector<2x8x1xf32>
    %139 = vector.broadcast %138 : vector<2x8x1xf32> to vector<2x8x16xf32>
    %140 = arith.divf %136, %139 : vector<2x8x16xf32>
    %141 = vector.extract_strided_slice %114 {offsets = [0, 0, 8], sizes = [2, 16, 8], strides = [1, 1, 1]} : vector<2x16x32xf32> to vector<2x16x8xf32>
    "tpu.trace_start"() <{level = 10 : i32, message = "bqk,bkh->bqh"}> : () -> ()
    %cst_56 = arith.constant dense<0.000000e+00> : vector<2x8x8xf32>
    %142 = tpu.matmul %140, %141, %cst_56 {dimension_numbers = #tpu.dot_dimension_numbers<[2], [1], [1], [2], [0, 0, 0, 1, 1, 2], [0], [0]>} : vector<2x8x16xf32>, vector<2x16x8xf32>, vector<2x8x8xf32> -> vector<2x8x8xf32>
    "tpu.trace_stop"() : () -> ()
    %143 = vector.extract_strided_slice %111 {offsets = [0, 0, 16], sizes = [2, 8, 8], strides = [1, 1, 1]} : vector<2x8x32xf32> to vector<2x8x8xf32>
    %144 = vector.extract_strided_slice %113 {offsets = [0, 0, 16], sizes = [2, 16, 8], strides = [1, 1, 1]} : vector<2x16x32xf32> to vector<2x16x8xf32>
    "tpu.trace_start"() <{level = 10 : i32, message = "bqh,bkh->bqk"}> : () -> ()
    %cst_57 = arith.constant dense<0.000000e+00> : vector<2x8x16xf32>
    %145 = tpu.matmul %143, %144, %cst_57 {dimension_numbers = #tpu.dot_dimension_numbers<[2], [2], [1], [1], [0, 0, 0, 1, 1, 1], [0], [0]>} : vector<2x8x8xf32>, vector<2x16x8xf32>, vector<2x8x16xf32> -> vector<2x8x16xf32>
    "tpu.trace_stop"() : () -> ()
    %cst_58 = arith.constant dense<0xFF800000> : vector<2x8xf32>
    %146 = vector.multi_reduction <maximumf>, %145, %cst_58 [2] : vector<2x8x16xf32> to vector<2x8xf32>
    %147 = vector.shape_cast %146 : vector<2x8xf32> to vector<2x8x1xf32>
    %148 = vector.broadcast %147 : vector<2x8x1xf32> to vector<2x8x16xf32>
    %149 = arith.subf %145, %148 : vector<2x8x16xf32>
    %150 = math.exp %149 : vector<2x8x16xf32>
    %cst_59 = arith.constant dense<0.000000e+00> : vector<2x8xf32>
    %151 = vector.multi_reduction <add>, %150, %cst_59 [2] : vector<2x8x16xf32> to vector<2x8xf32>
    %152 = vector.shape_cast %151 : vector<2x8xf32> to vector<2x8x1xf32>
    %153 = vector.broadcast %152 : vector<2x8x1xf32> to vector<2x8x16xf32>
    %154 = arith.divf %150, %153 : vector<2x8x16xf32>
    %155 = vector.extract_strided_slice %114 {offsets = [0, 0, 16], sizes = [2, 16, 8], strides = [1, 1, 1]} : vector<2x16x32xf32> to vector<2x16x8xf32>
    "tpu.trace_start"() <{level = 10 : i32, message = "bqk,bkh->bqh"}> : () -> ()
    %cst_60 = arith.constant dense<0.000000e+00> : vector<2x8x8xf32>
    %156 = tpu.matmul %154, %155, %cst_60 {dimension_numbers = #tpu.dot_dimension_numbers<[2], [1], [1], [2], [0, 0, 0, 1, 1, 2], [0], [0]>} : vector<2x8x16xf32>, vector<2x16x8xf32>, vector<2x8x8xf32> -> vector<2x8x8xf32>
    "tpu.trace_stop"() : () -> ()
    %157 = vector.extract_strided_slice %111 {offsets = [0, 0, 24], sizes = [2, 8, 8], strides = [1, 1, 1]} : vector<2x8x32xf32> to vector<2x8x8xf32>
    %158 = vector.extract_strided_slice %113 {offsets = [0, 0, 24], sizes = [2, 16, 8], strides = [1, 1, 1]} : vector<2x16x32xf32> to vector<2x16x8xf32>
    "tpu.trace_start"() <{level = 10 : i32, message = "bqh,bkh->bqk"}> : () -> ()
    %cst_61 = arith.constant dense<0.000000e+00> : vector<2x8x16xf32>
    %159 = tpu.matmul %157, %158, %cst_61 {dimension_numbers = #tpu.dot_dimension_numbers<[2], [2], [1], [1], [0, 0, 0, 1, 1, 1], [0], [0]>} : vector<2x8x8xf32>, vector<2x16x8xf32>, vector<2x8x16xf32> -> vector<2x8x16xf32>
    "tpu.trace_stop"() : () -> ()
    %cst_62 = arith.constant dense<0xFF800000> : vector<2x8xf32>
    %160 = vector.multi_reduction <maximumf>, %159, %cst_62 [2] : vector<2x8x16xf32> to vector<2x8xf32>
    %161 = vector.shape_cast %160 : vector<2x8xf32> to vector<2x8x1xf32>
    %162 = vector.broadcast %161 : vector<2x8x1xf32> to vector<2x8x16xf32>
    %163 = arith.subf %159, %162 : vector<2x8x16xf32>
    %164 = math.exp %163 : vector<2x8x16xf32>
    %cst_63 = arith.constant dense<0.000000e+00> : vector<2x8xf32>
    %165 = vector.multi_reduction <add>, %164, %cst_63 [2] : vector<2x8x16xf32> to vector<2x8xf32>
    %166 = vector.shape_cast %165 : vector<2x8xf32> to vector<2x8x1xf32>
    %167 = vector.broadcast %166 : vector<2x8x1xf32> to vector<2x8x16xf32>
    %168 = arith.divf %164, %167 : vector<2x8x16xf32>
    %169 = vector.extract_strided_slice %114 {offsets = [0, 0, 24], sizes = [2, 16, 8], strides = [1, 1, 1]} : vector<2x16x32xf32> to vector<2x16x8xf32>
    "tpu.trace_start"() <{level = 10 : i32, message = "bqk,bkh->bqh"}> : () -> ()
    %cst_64 = arith.constant dense<0.000000e+00> : vector<2x8x8xf32>
    %170 = tpu.matmul %168, %169, %cst_64 {dimension_numbers = #tpu.dot_dimension_numbers<[2], [1], [1], [2], [0, 0, 0, 1, 1, 2], [0], [0]>} : vector<2x8x16xf32>, vector<2x16x8xf32>, vector<2x8x8xf32> -> vector<2x8x8xf32>
    "tpu.trace_stop"() : () -> ()
    %171 = tpu.concatenate %128, %142, %156, %170 in 2 : vector<2x8x8xf32>, vector<2x8x8xf32>, vector<2x8x8xf32>, vector<2x8x8xf32> -> vector<2x8x32xf32>
    %172 = vector.shape_cast %171 : vector<2x8x32xf32> to vector<16x32xf32>
    %c0_65 = arith.constant 0 : index
    %c0_66 = arith.constant 0 : index
    %173 = vector.load %arg11[%c0_65, %c0_66] : memref<32x32xf32, #tpu.memory_space<vmem>>, vector<32x32xf32>
    %cst_67 = arith.constant dense<0.000000e+00> : vector<16x32xf32>
    %174 = tpu.matmul %172, %173, %cst_67 {dimension_numbers = #tpu.dot_dimension_numbers<[1], [0], [0], [1], [0, 0, 1, 1], [], []>} : vector<16x32xf32>, vector<32x32xf32>, vector<16x32xf32> -> vector<16x32xf32>
    %c0_68 = arith.constant 0 : index
    %c0_69 = arith.constant 0 : index
    %175 = vector.load %arg12[%c0_68, %c0_69] : memref<1x32xf32, #tpu.memory_space<vmem>>, vector<1x32xf32>
    %176 = vector.broadcast %175 : vector<1x32xf32> to vector<16x32xf32>
    %177 = arith.addf %174, %176 : vector<16x32xf32>
    %c0_70 = arith.constant 0 : index
    %c0_71 = arith.constant 0 : index
    %178 = vector.load %arg19[%c0_70, %c0_71] : memref<1x32xf32, #tpu.memory_space<vmem>>, vector<1x32xf32>
    %c0_72 = arith.constant 0 : index
    %c0_73 = arith.constant 0 : index
    %179 = vector.load %arg20[%c0_72, %c0_73] : memref<1x32xf32, #tpu.memory_space<vmem>>, vector<1x32xf32>
    %180 = arith.addf %100, %177 : vector<16x32xf32>
    %cst_74 = arith.constant dense<0.000000e+00> : vector<16xf32>
    %181 = vector.multi_reduction <add>, %180, %cst_74 [1] : vector<16x32xf32> to vector<16xf32>
    %182 = vector.shape_cast %181 : vector<16xf32> to vector<16x1xf32>
    %cst_75 = arith.constant 3.200000e+01 : f32
    %183 = vector.broadcast %cst_75 : f32 to vector<16x1xf32>
    %184 = arith.divf %182, %183 : vector<16x1xf32>
    %185 = vector.broadcast %184 : vector<16x1xf32> to vector<16x32xf32>
    %186 = arith.subf %180, %185 : vector<16x32xf32>
    %187 = arith.mulf %186, %186 : vector<16x32xf32>
    %cst_76 = arith.constant dense<0.000000e+00> : vector<16xf32>
    %188 = vector.multi_reduction <add>, %187, %cst_76 [1] : vector<16x32xf32> to vector<16xf32>
    %189 = vector.shape_cast %188 : vector<16xf32> to vector<16x1xf32>
    %cst_77 = arith.constant 3.200000e+01 : f32
    %190 = vector.broadcast %cst_77 : f32 to vector<16x1xf32>
    %191 = arith.divf %189, %190 : vector<16x1xf32>
    %cst_78 = arith.constant 9.99999974E-6 : f32
    %192 = vector.broadcast %cst_78 : f32 to vector<16x1xf32>
    %193 = arith.addf %191, %192 : vector<16x1xf32>
    %194 = math.rsqrt %193 : vector<16x1xf32>
    %195 = vector.broadcast %194 : vector<16x1xf32> to vector<16x32xf32>
    %196 = arith.mulf %186, %195 : vector<16x32xf32>
    %197 = vector.broadcast %178 : vector<1x32xf32> to vector<16x32xf32>
    %198 = arith.mulf %196, %197 : vector<16x32xf32>
    %199 = vector.broadcast %179 : vector<1x32xf32> to vector<16x32xf32>
    %200 = arith.addf %198, %199 : vector<16x32xf32>
    %c0_79 = arith.constant 0 : index
    %c0_80 = arith.constant 0 : index
    %201 = vector.load %arg13[%c0_79, %c0_80] : memref<32x64xf32, #tpu.memory_space<vmem>>, vector<32x64xf32>
    %cst_81 = arith.constant dense<0.000000e+00> : vector<16x64xf32>
    %202 = tpu.matmul %200, %201, %cst_81 {dimension_numbers = #tpu.dot_dimension_numbers<[1], [0], [0], [1], [0, 0, 1, 1], [], []>} : vector<16x32xf32>, vector<32x64xf32>, vector<16x64xf32> -> vector<16x64xf32>
    %c0_82 = arith.constant 0 : index
    %c0_83 = arith.constant 0 : index
    %203 = vector.load %arg14[%c0_82, %c0_83] : memref<1x64xf32, #tpu.memory_space<vmem>>, vector<1x64xf32>
    %204 = vector.broadcast %203 : vector<1x64xf32> to vector<16x64xf32>
    %205 = arith.addf %202, %204 : vector<16x64xf32>
    %cst_84 = arith.constant 0.000000e+00 : f32
    %206 = vector.broadcast %cst_84 : f32 to vector<16x64xf32>
    %207 = arith.maximumf %205, %206 : vector<16x64xf32>
    %c0_85 = arith.constant 0 : index
    %c0_86 = arith.constant 0 : index
    %208 = vector.load %arg15[%c0_85, %c0_86] : memref<64x32xf32, #tpu.memory_space<vmem>>, vector<64x32xf32>
    %cst_87 = arith.constant dense<0.000000e+00> : vector<16x32xf32>
    %209 = tpu.matmul %207, %208, %cst_87 {dimension_numbers = #tpu.dot_dimension_numbers<[1], [0], [0], [1], [0, 0, 1, 1], [], []>} : vector<16x64xf32>, vector<64x32xf32>, vector<16x32xf32> -> vector<16x32xf32>
    %c0_88 = arith.constant 0 : index
    %c0_89 = arith.constant 0 : index
    %210 = vector.load %arg16[%c0_88, %c0_89] : memref<1x32xf32, #tpu.memory_space<vmem>>, vector<1x32xf32>
    %211 = vector.broadcast %210 : vector<1x32xf32> to vector<16x32xf32>
    %212 = arith.addf %209, %211 : vector<16x32xf32>
    %c0_90 = arith.constant 0 : index
    %c0_91 = arith.constant 0 : index
    %213 = vector.load %arg21[%c0_90, %c0_91] : memref<1x32xf32, #tpu.memory_space<vmem>>, vector<1x32xf32>
    %c0_92 = arith.constant 0 : index
    %c0_93 = arith.constant 0 : index
    %214 = vector.load %arg22[%c0_92, %c0_93] : memref<1x32xf32, #tpu.memory_space<vmem>>, vector<1x32xf32>
    %215 = arith.addf %200, %212 : vector<16x32xf32>
    %cst_94 = arith.constant dense<0.000000e+00> : vector<16xf32>
    %216 = vector.multi_reduction <add>, %215, %cst_94 [1] : vector<16x32xf32> to vector<16xf32>
    %217 = vector.shape_cast %216 : vector<16xf32> to vector<16x1xf32>
    %cst_95 = arith.constant 3.200000e+01 : f32
    %218 = vector.broadcast %cst_95 : f32 to vector<16x1xf32>
    %219 = arith.divf %217, %218 : vector<16x1xf32>
    %220 = vector.broadcast %219 : vector<16x1xf32> to vector<16x32xf32>
    %221 = arith.subf %215, %220 : vector<16x32xf32>
    %222 = arith.mulf %221, %221 : vector<16x32xf32>
    %cst_96 = arith.constant dense<0.000000e+00> : vector<16xf32>
    %223 = vector.multi_reduction <add>, %222, %cst_96 [1] : vector<16x32xf32> to vector<16xf32>
    %224 = vector.shape_cast %223 : vector<16xf32> to vector<16x1xf32>
    %cst_97 = arith.constant 3.200000e+01 : f32
    %225 = vector.broadcast %cst_97 : f32 to vector<16x1xf32>
    %226 = arith.divf %224, %225 : vector<16x1xf32>
    %cst_98 = arith.constant 9.99999974E-6 : f32
    %227 = vector.broadcast %cst_98 : f32 to vector<16x1xf32>
    %228 = arith.addf %226, %227 : vector<16x1xf32>
    %229 = math.rsqrt %228 : vector<16x1xf32>
    %230 = vector.broadcast %229 : vector<16x1xf32> to vector<16x32xf32>
    %231 = arith.mulf %221, %230 : vector<16x32xf32>
    %232 = vector.broadcast %213 : vector<1x32xf32> to vector<16x32xf32>
    %233 = arith.mulf %231, %232 : vector<16x32xf32>
    %234 = vector.broadcast %214 : vector<1x32xf32> to vector<16x32xf32>
    %235 = arith.addf %233, %234 : vector<16x32xf32>
    %236 = vector.shape_cast %235 : vector<16x32xf32> to vector<2x8x32xf32>
    %c0_99 = arith.constant 0 : index
    %c0_100 = arith.constant 0 : index
    %c0_101 = arith.constant 0 : index
    %237 = vector.load %arg23[%c0_99, %c0_100, %c0_101] : memref<2x8x32xf32, #tpu.memory_space<vmem>>, vector<2x8x32xf32>
    tpu.vector_store %arg23[%c0_99, %c0_100, %c0_101], %236 {strides = array<i32>} : memref<2x8x32xf32, #tpu.memory_space<vmem>>, vector<2x8x32xf32>,
    return
  }
  func.func @transform_0(%arg0: i32) -> (i32, i32, i32) {
    %c0_i32 = arith.constant 0 : i32
    %c0_i32_0 = arith.constant 0 : i32
    %c0_i32_1 = arith.constant 0 : i32
    %c0_i32_2 = arith.constant 0 : i32
    return %c0_i32, %c0_i32_0, %c0_i32_1 : i32, i32, i32
  }
  func.func @transform_1(%arg0: i32) -> (i32, i32, i32) {
    %c0_i32 = arith.constant 0 : i32
    %c0_i32_0 = arith.constant 0 : i32
    %c0_i32_1 = arith.constant 0 : i32
    %c0_i32_2 = arith.constant 0 : i32
    return %c0_i32, %c0_i32_0, %c0_i32_1 : i32, i32, i32
  }
  func.func @transform_2(%arg0: i32) -> (i32, i32) {
    %c0_i32 = arith.constant 0 : i32
    %c0_i32_0 = arith.constant 0 : i32
    %c0_i32_1 = arith.constant 0 : i32
    return %c0_i32, %c0_i32_0 : i32, i32
  }
  func.func @transform_3(%arg0: i32) -> (i32, i32) {
    %c0_i32 = arith.constant 0 : i32
    %c0_i32_0 = arith.constant 0 : i32
    %c0_i32_1 = arith.constant 0 : i32
    return %c0_i32, %c0_i32_0 : i32, i32
  }
  func.func @transform_4(%arg0: i32) -> (i32, i32) {
    %c0_i32 = arith.constant 0 : i32
    %c0_i32_0 = arith.constant 0 : i32
    %c0_i32_1 = arith.constant 0 : i32
    return %c0_i32, %c0_i32_0 : i32, i32
  }
  func.func @transform_5(%arg0: i32) -> (i32, i32) {
    %c0_i32 = arith.constant 0 : i32
    %c0_i32_0 = arith.constant 0 : i32
    %c0_i32_1 = arith.constant 0 : i32
    return %c0_i32, %c0_i32_0 : i32, i32
  }
  func.func @transform_6(%arg0: i32) -> (i32, i32) {
    %c0_i32 = arith.constant 0 : i32
    %c0_i32_0 = arith.constant 0 : i32
    %c0_i32_1 = arith.constant 0 : i32
    return %c0_i32, %c0_i32_0 : i32, i32
  }
  func.func @transform_7(%arg0: i32) -> (i32, i32) {
    %c0_i32 = arith.constant 0 : i32
    %c0_i32_0 = arith.constant 0 : i32
    %c0_i32_1 = arith.constant 0 : i32
    return %c0_i32, %c0_i32_0 : i32, i32
  }
  func.func @transform_8(%arg0: i32) -> (i32, i32) {
    %c0_i32 = arith.constant 0 : i32
    %c0_i32_0 = arith.constant 0 : i32
    %c0_i32_1 = arith.constant 0 : i32
    return %c0_i32, %c0_i32_0 : i32, i32
  }
  func.func @transform_9(%arg0: i32) -> (i32, i32) {
    %c0_i32 = arith.constant 0 : i32
    %c0_i32_0 = arith.constant 0 : i32
    %c0_i32_1 = arith.constant 0 : i32
    return %c0_i32, %c0_i32_0 : i32, i32
  }
  func.func @transform_10(%arg0: i32) -> (i32, i32) {
    %c0_i32 = arith.constant 0 : i32
    %c0_i32_0 = arith.constant 0 : i32
    %c0_i32_1 = arith.constant 0 : i32
    return %c0_i32, %c0_i32_0 : i32, i32
  }
  func.func @transform_11(%arg0: i32) -> (i32, i32) {
    %c0_i32 = arith.constant 0 : i32
    %c0_i32_0 = arith.constant 0 : i32
    %c0_i32_1 = arith.constant 0 : i32
    return %c0_i32, %c0_i32_0 : i32, i32
  }
  func.func @transform_12(%arg0: i32) -> (i32, i32) {
    %c0_i32 = arith.constant 0 : i32
    %c0_i32_0 = arith.constant 0 : i32
    %c0_i32_1 = arith.constant 0 : i32
    return %c0_i32, %c0_i32_0 : i32, i32
  }
  func.func @transform_13(%arg0: i32) -> (i32, i32) {
    %c0_i32 = arith.constant 0 : i32
    %c0_i32_0 = arith.constant 0 : i32
    %c0_i32_1 = arith.constant 0 : i32
    return %c0_i32, %c0_i32_0 : i32, i32
  }
  func.func @transform_14(%arg0: i32) -> (i32, i32) {
    %c0_i32 = arith.constant 0 : i32
    %c0_i32_0 = arith.constant 0 : i32
    %c0_i32_1 = arith.constant 0 : i32
    return %c0_i32, %c0_i32_0 : i32, i32
  }
  func.func @transform_15(%arg0: i32) -> (i32, i32) {
    %c0_i32 = arith.constant 0 : i32
    %c0_i32_0 = arith.constant 0 : i32
    %c0_i32_1 = arith.constant 0 : i32
    return %c0_i32, %c0_i32_0 : i32, i32
  }
  func.func @transform_16(%arg0: i32) -> (i32, i32) {
    %c0_i32 = arith.constant 0 : i32
    %c0_i32_0 = arith.constant 0 : i32
    %c0_i32_1 = arith.constant 0 : i32
    return %c0_i32, %c0_i32_0 : i32, i32
  }
  func.func @transform_17(%arg0: i32) -> (i32, i32) {
    %c0_i32 = arith.constant 0 : i32
    %c0_i32_0 = arith.constant 0 : i32
    %c0_i32_1 = arith.constant 0 : i32
    return %c0_i32, %c0_i32_0 : i32, i32
  }
  func.func @transform_18(%arg0: i32) -> (i32, i32) {
    %c0_i32 = arith.constant 0 : i32
    %c0_i32_0 = arith.constant 0 : i32
    %c0_i32_1 = arith.constant 0 : i32
    return %c0_i32, %c0_i32_0 : i32, i32
  }
  func.func @transform_19(%arg0: i32) -> (i32, i32) {
    %c0_i32 = arith.constant 0 : i32
    %c0_i32_0 = arith.constant 0 : i32
    %c0_i32_1 = arith.constant 0 : i32
    return %c0_i32, %c0_i32_0 : i32, i32
  }
  func.func @transform_20(%arg0: i32) -> (i32, i32) {
    %c0_i32 = arith.constant 0 : i32
    %c0_i32_0 = arith.constant 0 : i32
    %c0_i32_1 = arith.constant 0 : i32
    return %c0_i32, %c0_i32_0 : i32, i32
  }
  func.func @transform_21(%arg0: i32) -> (i32, i32) {
    %c0_i32 = arith.constant 0 : i32
    %c0_i32_0 = arith.constant 0 : i32
    %c0_i32_1 = arith.constant 0 : i32
    return %c0_i32, %c0_i32_0 : i32, i32
  }
  func.func @transform_22(%arg0: i32) -> (i32, i32, i32) {
    %c0_i32 = arith.constant 0 : i32
    %c0_i32_0 = arith.constant 0 : i32
    %c0_i32_1 = arith.constant 0 : i32
    %c0_i32_2 = arith.constant 0 : i32
    return %c0_i32, %c0_i32_0, %c0_i32_1 : i32, i32, i32
  }
}

</mosaic_0001>

<bundles_post_ra>
// kernel: tpu_custom_call.1
= control target key start
LH: loop header
LB: loop body
LE: loop exit
PB: predicated region body
PF: predicated region fallthrough
CT: control target
= control target key end

     0   :  { %s5364_s0 = inlined_call_operand.hbm [shape: f32[2,8,32], index: 0, kind: input, shape index: {}]   ;;  %s5365_s1 = inlined_call_operand.vmem [shape: f32[2,16,32], index: 1, kind: input, shape index: {}]   ;;  %s5366_s2 = inlined_call_operand.vmem [shape: f32[32,96], index: 2, kind: input, shape index: {}]   ;;  %s5367_s3 = inlined_call_operand.vmem [shape: f32[1,96], index: 3, kind: input, shape index: {}]   ;;  %s5368_s4 = inlined_call_operand.vmem [shape: f32[32,32], index: 4, kind: input, shape index: {}]   ;;  %s5369_s5 = inlined_call_operand.vmem [shape: f32[1,32], index: 5, kind: input, shape index: {}]   ;;  %s5370_s6 = inlined_call_operand.hbm [shape: f32[32,32], index: 6, kind: input, shape index: {}]   ;;  %s5371_s7 = inlined_call_operand.vmem [shape: f32[1,32], index: 7, kind: input, shape index: {}]   ;;  %s5372_s8 = inlined_call_operand.hbm [shape: f32[32,64], index: 8, kind: input, shape index: {}]   ;;  %s5373_s9 = inlined_call_operand.vmem [shape: f32[1,64], index: 9, kind: input, shape index: {}]   ;;  %s5374_s10 = inlined_call_operand.hbm [shape: f32[32,32], index: 10, kind: input, shape index: {}]   ;;  %s5375_s11 = inlined_call_operand.vmem [shape: f32[1,32], index: 11, kind: input, shape index: {}]   ;;  %s5376_s12 = inlined_call_operand.hbm [shape: f32[32,64], index: 12, kind: input, shape index: {}]   ;;  %s5377_s13 = inlined_call_operand.vmem [shape: f32[1,64], index: 13, kind: input, shape index: {}]   ;;  %s5378_s14 = inlined_call_operand.vmem [shape: f32[64,32], index: 14, kind: input, shape index: {}]   ;;  %s5379_s15 = inlined_call_operand.vmem [shape: f32[1,32], index: 15, kind: input, shape index: {}]   ;;  %s5380_s16 = inlined_call_operand.vmem [shape: f32[1,32], index: 16, kind: input, shape index: {}]   ;;  %s5381_s17 = inlined_call_operand.vmem [shape: f32[1,32], index: 17, kind: input, shape index: {}]   ;;  %s5382_s18 = inlined_call_operand.vmem [shape: f32[1,32], index: 18, kind: input, shape index: {}]   ;;  %s5383_s19 = inlined_call_operand.vmem [shape: f32[1,32], index: 19, kind: input, shape index: {}]   ;;  %s5384_s20 = inlined_call_operand.vmem [shape: f32[1,32], index: 20, kind: input, shape index: {}]   ;;  %s5385_s21 = inlined_call_operand.vmem [shape: f32[1,32], index: 21, kind: input, shape index: {}]   ;;  %s5386_s22 = inlined_call_operand.hbm [shape: f32[2,8,32], index: 22, kind: output, shape index: {}]  }
   0x1   :  { %5393 = sst [smem:[#allocation16_spill]] %s5364_s0 }
   0x2   :  { %5394 = sst [smem:[#allocation17_spill]] %s5365_s1 }
   0x3   :  { %5395 = sst [smem:[#allocation18_spill]] %s5366_s2 }
   0x4   :  { %5396 = sst [smem:[#allocation19_spill]] %s5367_s3 }
   0x5   :  { %5397 = sst [smem:[#allocation20_spill]] %s5368_s4 }
   0x6   :  { %5398 = sst [smem:[#allocation21_spill]] %s5369_s5 }
   0x7   :  { %5399 = sst [smem:[#allocation22_spill]] %s5370_s6 }
   0x8   :  { %5400 = sst [smem:[#allocation23_spill]] %s5385_s21 }
   0x9   :  { %5401 = sst [smem:[#allocation24_spill]] %s5386_s22 }
   0xa   :  { %27 = vsyncpa [#allocation3], 0 }
   0xb   :  { %28 = vsyncpa [#allocation6], 0 }
   0xc   :  { %29 = vsyncpa [#allocation9], 0 }
   0xd   :  { %30 = vsyncpa [#allocation4], 0  ;;  %s4648_s3 = smov [#allocation5]   ;;  %s4649_s29 = smov [#allocation8]  }
   0xe   :  { %s58_s28 = sshll.u32 %s4648_s3, 4  ;;  %s86_s30 = sshll.u32 %s4649_s29, 4  ;;  %s59_s28 = int_to_ptr.vmem [resolvable:$true] %s58_s28  ;;  %s4787_s30 = int_to_ptr.vmem [resolvable:$true] %s86_s30 }
   0xf   :  { %s5402_s23 = sld [smem:[#allocation22_spill]] }
  0x15   :  { %s4508_s1 = scalar_lea.hbm %s5402_s23, 512 }
  0x16   :  { %p4509_p0 = scmp.ne.s32.totalorder %s5402_s23, %s4508_s1  ;;  %p4512_p1 = scmp.lt.u32.totalorder %s4508_s1, %s5402_s23 }
  0x18   :  { %p4514_p2 = pnand %p4512_p1, %p4509_p0 }
  0x1a   :  { %4517 = shalt.err (!%p4514_p2)
}
  0x1b   :  { %s4518_s26 = scalar_lea.vmem %s59_s28, 512  ;;  %p4523_p4 = scmp.lt.s32.totalorder %s59_s28, %s59_s28 }
  0x1c   :  { %p4519_p3 = scmp.ne.s32.totalorder %s59_s28, %s4518_s26  ;;  %p4524_p5 = scmp.lt.s32.totalorder %s4518_s26, %s4518_s26 }
  0x1e   :  { %p4525_p6 = por %p4524_p5, %p4523_p4 }
  0x20   :  { %p4526_p7 = pnand %p4525_p6, %p4519_p3 }
  0x22   :  { %4529 = shalt.err (!%p4526_p7)
}
  0x23   :  { %s4650_s2 = smov 128   ;;  %s4651_s27 = smov 8  }
  0x24   :  { %64 = dma.hbm_to_vmem [thread:$0]  %s5402_s23, 512, %s59_s28, [#allocation6], %s4650_s2, %s4650_s2, %s4651_s27  }
  0x25   :  { %s4530_s1 = scalar_lea.hbm %s5374_s10, 512 }
  0x26   :  { %p4531_p8 = scmp.ne.s32.totalorder %s5374_s10, %s4530_s1  ;;  %p4534_p9 = scmp.lt.u32.totalorder %s4530_s1, %s5374_s10 }
  0x28   :  { %p4536_p10 = pnand %p4534_p9, %p4531_p8 }
  0x2a   :  { %4539 = shalt.err (!%p4536_p10)
}
  0x2b   :  { %s4540_s26 = scalar_lea.vmem %s4787_s30, 512  ;;  %p4545_p12 = scmp.lt.s32.totalorder %s4787_s30, %s4787_s30 }
  0x2c   :  { %p4541_p11 = scmp.ne.s32.totalorder %s4787_s30, %s4540_s26  ;;  %p4546_p13 = scmp.lt.s32.totalorder %s4540_s26, %s4540_s26 }
  0x2e   :  { %p4547_p0 = por %p4546_p13, %p4545_p12 }
  0x30   :  { %p4548_p1 = pnand %p4547_p0, %p4541_p11 }
  0x32   :  { %4551 = shalt.err (!%p4548_p1)
}
  0x33   :  { %92 = dma.hbm_to_vmem [thread:$0]  %s5374_s10, 512, %s4787_s30, [#allocation9], %s4650_s2, %s4650_s2, %s4651_s27  }
  0x34   :  { %s4652_s3 = smov [#allocation2]   ;;  %s4653_s4 = smov [#allocation7]  }
  0x35   :  { %s36_s29 = sshll.u32 %s4652_s3, 4  ;;  %s72_s0 = sshll.u32 %s4653_s4, 4  ;;  %s37_s29 = int_to_ptr.vmem [resolvable:$true] %s36_s29  ;;  %s4824_s0 = int_to_ptr.vmem [resolvable:$true] %s72_s0 }
  0x36   :  { %s5403_s24 = sld [smem:[#allocation16_spill]] }
  0x3c   :  { %s4552_s6 = scalar_lea.hbm %s5403_s24, 256 }
  0x3d   :  { %p4553_p2 = scmp.ne.s32.totalorder %s5403_s24, %s4552_s6  ;;  %p4556_p3 = scmp.lt.u32.totalorder %s4552_s6, %s5403_s24 }
  0x3f   :  { %p4558_p4 = pnand %p4556_p3, %p4553_p2 }
  0x41   :  { %4561 = shalt.err (!%p4558_p4)
}
  0x42   :  { %s4562_s10 = scalar_lea.vmem %s37_s29, 256  ;;  %p4567_p6 = scmp.lt.s32.totalorder %s37_s29, %s37_s29 }
  0x43   :  { %p4563_p5 = scmp.ne.s32.totalorder %s37_s29, %s4562_s10  ;;  %p4568_p7 = scmp.lt.s32.totalorder %s4562_s10, %s4562_s10 }
  0x45   :  { %p4569_p8 = por %p4568_p7, %p4567_p6 }
  0x47   :  { %p4570_p9 = pnand %p4569_p8, %p4563_p5 }
  0x49   :  { %4573 = shalt.err (!%p4570_p9)
}
  0x4a   :  { %42 = dma.hbm_to_vmem [thread:$0]  %s5403_s24, 256, %s37_s29, [#allocation3], %s4650_s2, %s4650_s2, %s4651_s27  }
  0x4b   :  { %s4574_s21 = scalar_lea.hbm %s5372_s8, 512 }
  0x4c   :  { %p4575_p10 = scmp.ne.s32.totalorder %s5372_s8, %s4574_s21  ;;  %p4578_p11 = scmp.lt.u32.totalorder %s4574_s21, %s5372_s8 }
  0x4e   :  { %p4580_p12 = pnand %p4578_p11, %p4575_p10 }
  0x50   :  { %4583 = shalt.err (!%p4580_p12)
}
  0x51   :  { %s4584_s6 = scalar_lea.vmem %s4824_s0, 512  ;;  %p4589_p0 = scmp.lt.s32.totalorder %s4824_s0, %s4824_s0 }
  0x52   :  { %p4585_p13 = scmp.ne.s32.totalorder %s4824_s0, %s4584_s6  ;;  %p4590_p1 = scmp.lt.s32.totalorder %s4584_s6, %s4584_s6 }
  0x54   :  { %p4591_p2 = por %p4590_p1, %p4589_p0 }
  0x56   :  { %p4592_p3 = pnand %p4591_p2, %p4585_p13 }
  0x58   :  { %4595 = shalt.err (!%p4592_p3)
}
  0x59   :  { %78 = dma.hbm_to_vmem [thread:$0]  %s5372_s8, 512, %s4824_s0, [#allocation6], %s4650_s2, %s4650_s2, %s4651_s27  }
  0x5a   :  { %s4654_s25 = smov [#allocation10]   ;;  %s4596_s28 = scalar_lea.hbm %s5376_s12, 512 }
  0x5b   :  { %s100_s26 = sshll.u32 %s4654_s25, 4  ;;  %p4597_p4 = scmp.ne.s32.totalorder %s5376_s12, %s4596_s28  ;;  %s101_s26 = int_to_ptr.vmem [resolvable:$true] %s100_s26 }
  0x5c   :  { %p4600_p5 = scmp.lt.u32.totalorder %s4596_s28, %s5376_s12 }
  0x5e   :  { %p4602_p6 = pnand %p4600_p5, %p4597_p4 }
  0x60   :  { %4605 = shalt.err (!%p4602_p6)
}
  0x61   :  { %s4606_s4 = scalar_lea.vmem %s101_s26, 512  ;;  %p4611_p8 = scmp.lt.s32.totalorder %s101_s26, %s101_s26 }
  0x62   :  { %p4607_p7 = scmp.ne.s32.totalorder %s101_s26, %s4606_s4  ;;  %p4612_p9 = scmp.lt.s32.totalorder %s4606_s4, %s4606_s4 }
  0x64   :  { %p4613_p10 = por %p4612_p9, %p4611_p8 }
  0x66   :  { %p4614_p11 = pnand %p4613_p10, %p4607_p7 }
  0x68   :  { %4617 = shalt.err (!%p4614_p11)
}
  0x69   :  { %106 = dma.hbm_to_vmem [thread:$0]  %s5376_s12, 512, %s101_s26, [#allocation9], %s4650_s2, %s4650_s2, %s4651_s27  }
  0x6a   :  { %4640 = dma.done.wait [#allocation3], 256  }
  0x6b   :  { %4641 = vsyncadd [#allocation3], 4294967040 }
  0x6c   :  { %4642 = dma.done.wait [#allocation6], 1024  }
  0x6d   :  { %4643 = vsyncadd [#allocation6], 4294966272 }
  0x6e   :  { %4644 = dma.done.wait [#allocation9], 1024  }
  0x6f   :  { %4645 = vsyncadd [#allocation9], 4294966272  ;;  %vm157_vm0 = vcmask 261120   ;;  %s5404_s6 = sld [smem:[#allocation18_spill]]  ;;  %v4888_v5 = vld [vmem:[#allocation2] sm:$0xff]  ;;  %v4892_v7 = vld [vmem:[#allocation2 + $0x8] sm:$0xff] }
  0x70   :  { %3946 = vmatprep.mubr.msk.f32.mxu1 %vm157_vm0, %v4888_v5  ;;  %v4655_v8 = vmov 0.0   ;;  %vm4656_vm1 = vmmov 0   ;;  %s5405_s23 = sld [smem:[#allocation19_spill]]  ;;  %s4657_s3 = smov 96   ;;  %vm242_vm2 = vcmask 64512   ;;  %vm1587_vm3 = vcmask 195584  }
  0x71   :  { %3959 = vmatprep.subr.mxu0 %v4655_v8  ;;  %3961 = vmatprep.mubr.msk.f32.mxu0 %vm4656_vm1, %v4655_v8  ;;  %s4658_s21 = smov 64   ;;  %s4659_s22 = smov 88   ;;  %vm1584_vm4 = vcmask 130048   ;;  %vm5117_vm5 = vmpackc.low %vm242_vm2, %vm242_vm2  ;;  %vm3576_vm6 = vcmask 523264  }
  0x72   :  { %s4660_s4 = smov 120   ;;  %s4661_s8 = smov 56  }
  0x73   :  { %s4662_s0 = smov 80   ;;  %s4663_s1 = smov 112  }
  0x74   :  { %s4664_s5 = smov 48   ;;  %s4666_s29 = smov 104  }
  0x75   :  { %v146_v0 = vld [vmem:[%s5404_s6] sm:$0xff]  ;;  %v147_v1 = vld [vmem:[%s5404_s6 + $0x8] sm:$0xff]  ;;  %v148_v2 = vld [vmem:[%s5404_s6 + $0x10] sm:$0xff]  ;;  %s4667_s24 = smov 40   ;;  %s4668_s25 = smov 16  }
  0x76   :  { %v4218_v3 = vpack.c.bf16 %v147_v1, %v146_v0  ;;  %v149_v4 = vld [vmem:[%s5404_s6 + $0x18] sm:$0xff]  ;;  %v3725_v9 = vld [vmem:[%s5405_s23] ss:$0 sm:$0xff]  ;;  %s4665_s6 = smov 72   ;;  %s5406_s26 = sld [smem:[#allocation20_spill]] }
  0x77   :  { %v4222_v6 = vpack.c.bf16 %v149_v4, %v148_v2  ;;  %s5408_s23 = sld [smem:[#allocation17_spill]] }
  0x78   :  { %4219 = vmatprep.subr.bf16.mxu1 %v4218_v3 }
  0x79   :  { %4221 = vmatpush3.bf16.msra.mxu1 %v4218_v3 }
  0x7a   :  { %4223 = vmatprep.subr.bf16.mxu1 %v4222_v6 }
  0x7d   :  { %4225 = vmatpush3.bf16.msra.mxu1 %v4222_v6 }
  0x7e   :  { %3949 = vmatprep.subr.mxu1 %v4655_v8 }
  0x80   :  { %3947 = vmatmul.mubr.msk.f32.vlgmr.msra.gmra.mrb[0].mxu1 %vm157_vm0, %v4892_v7 }
  0x81   :  { %3951 = vmatprep.mubr.msk.f32.mxu1 %vm4656_vm1, %v4655_v8 }
 0x153   :  { %v3948_v10 = vpop.f32.mrb[0].mxu1 }
 0x154   :  { %v230_v11 = vpop.f32.mrb[1].mxu1  ;;  %v4909_v13 = vadd.f32 %v3948_v10, %v3725_v9 }
 0x155   :  { %v4905_v12 = vadd.f32 %v3725_v9, %v230_v11 }
 0x157   :  { %240 = vrot.lane.b32.xlu0 %v4905_v12, %s4657_s3 }
 0x15b   :  { %318 = vrot.lane.b32.xlu0 %v4909_v13, %s4657_s3 }
 0x1c9   :  { %v241_v14 = vpop.permute.xlu0 %240 }
 0x1ca   :  { %3950 = vmatpush3.xpose.msk.msra.mxu1 %vm242_vm2, %v241_v14 }
 0x1cb   :  { %3954 = vmatprep.subr.mxu1 %v4655_v8 }
 0x1cd   :  { %3952 = vmatmul.mubr.msk.f32.vlgmr.msra.gmra.mrb[2].mxu1 %vm242_vm2, %v4905_v12  ;;  %v319_v15 = vpop.permute.xlu0 %318 }
 0x1ce   :  { %3955 = vmatpush3.xpose.msk.msra.mxu1 %vm242_vm2, %v319_v15  ;;  %3956 = vmatprep.mubr.msk.f32.mxu1 %vm4656_vm1, %v4655_v8 }
 0x1cf   :  { %3964 = vmatprep.subr.mxu1 %v4655_v8 }
 0x1d1   :  { %3957 = vmatmul.mubr.msk.f32.vlgmr.msra.gmra.mrb[4].mxu1 %vm242_vm2, %v4909_v13 }
 0x1d2   :  { %3966 = vmatprep.mubr.msk.f32.mxu1 %vm4656_vm1, %v4655_v8 }
 0x2a0   :  { %v313_v16 = vpop.f32.mrb[2].mxu1 }
 0x2a1   :  { %v3953_v17 = vpop.f32.mrb[3].mxu1  ;;  %v394_v18 = vsel %vm242_vm2, %v313_v16, -inf }
 0x2a2   :  { %395 = vmax.xlane.f32.xlu1 %v394_v18 }
 0x2a4   :  { %v390_v19 = vpop.f32.mrb[4].mxu1 }
 0x2a5   :  { %v3958_v20 = vpop.f32.mrb[5].mxu1  ;;  %v397_v21 = vsel %vm242_vm2, %v390_v19, -inf }
 0x2a6   :  { %398 = vmax.xlane.f32.xlu1 %v397_v21 }
 0x2b7   :  { %416 = vrot.lane.b32.xlu1 %v4905_v12, %s4658_s21 }
 0x2bb   :  { %492 = vrot.lane.b32.xlu1 %v4909_v13, %s4658_s21 }
 0x2bf   :  { %570 = vrot.lane.b32.xlu1 %v4905_v12, %s4659_s22 }
 0x2c3   :  { %648 = vrot.lane.b32.xlu1 %v4909_v13, %s4659_s22 }
 0x32f   :  { %v396_v22 = vpop.xlane.xlu1 %395 }
 0x330   :  { %v400_v23 = vsub.f32 %v313_v16, %v396_v22 }
 0x332   :  { %v402_v24 = vmul.f32 1.442695, %v400_v23 }
 0x333   :  { %v399_v25 = vpop.xlane.xlu1 %398 }
 0x334   :  { %4432 = vpow2.f32 %v402_v24  ;;  %v401_v26 = vsub.f32 %v390_v19, %v399_v25 }
 0x336   :  { %v404_v27 = vmul.f32 1.442695, %v401_v26 }
 0x337   :  { %v417_v28 = vpop.permute.xlu1 %416 }
 0x338   :  { %4434 = vpow2.f32 %v404_v27  ;;  %3960 = vmatpush3.msra.mxu0 %v417_v28 }
 0x339   :  { %3969 = vmatprep.subr.mxu0 %v4655_v8 }
 0x33b   :  { %v493_v29 = vpop.permute.xlu1 %492 }
 0x33c   :  { %3965 = vmatpush3.msra.mxu1 %v493_v29 }
 0x33d   :  { %3974 = vmatprep.subr.mxu1 %v4655_v8 }
 0x33e   :  { %v4433_v30 = vpop.eup %4432 }
 0x33f   :  { %v406_v31 = vsel %vm242_vm2, %v4433_v30, 0.0  ;;  %v571_v34 = vpop.permute.xlu1 %570 }
 0x340   :  { %407 = vadd.xlane.f32.xlu0 %v406_v31 }
 0x342   :  { %v4435_v32 = vpop.eup %4434 }
 0x343   :  { %v409_v33 = vsel %vm242_vm2, %v4435_v32, 0.0  ;;  %v649_v35 = vpop.permute.xlu1 %648 }
 0x344   :  { %410 = vadd.xlane.f32.xlu1 %v409_v33 }
 0x355   :  { %646 = vrot.lane.b32.xlu1 %v4909_v13, %s4660_s4 }
 0x356   :  { %568 = vrot.lane.b32.xlu0 %v4905_v12, %s4660_s4 }
 0x3cd   :  { %v408_v36 = vpop.xlane.xlu0 %407 }
 0x3ce   :  { %4436 = vrcp.f32 %v408_v36 }
 0x3d1   :  { %v411_v37 = vpop.xlane.xlu1 %410  ;;  %v569_v42 = vpop.permute.xlu0 %568 }
 0x3d2   :  { %4438 = vrcp.f32 %v411_v37 }
 0x3d5   :  { %v647_v43 = vpop.permute.xlu1 %646 }
 0x3d8   :  { %v4437_v38 = vpop.eup %4436 }
 0x3d9   :  { %v413_v39 = vmul.f32 %v4437_v38, %v4433_v30 }
 0x3db   :  { %3962 = vmatmul.mubr.msk.f32.vlgmr.msra.gmra.mrb[0].mxu0 %vm242_vm2, %v413_v39 }
 0x3dc   :  { %v4439_v40 = vpop.eup %4438  ;;  %3970 = vmatpush3.xpose.msk.msra.mxu0 %vm242_vm2, %v571_v34  ;;  %3971 = vmatprep.mubr.msk.f32.mxu0 %vm4656_vm1, %v4655_v8 }
 0x3dd   :  { %v415_v41 = vmul.f32 %v4439_v40, %v4435_v32  ;;  %3979 = vmatprep.subr.mxu0 %v4655_v8 }
 0x3df   :  { %3967 = vmatmul.mubr.msk.f32.vlgmr.msra.gmra.mrb[6].mxu1 %vm242_vm2, %v415_v41  ;;  %3972 = vmatmul.mubr.msk.f32.vlgmr.msra.gmra.mrb[2].mxu0 %vm242_vm2, %v569_v42 }
 0x3e0   :  { %3975 = vmatpush3.xpose.msk.msra.mxu1 %vm242_vm2, %v649_v35  ;;  %3976 = vmatprep.mubr.msk.f32.mxu1 %vm4656_vm1, %v4655_v8 }
 0x3e1   :  { %3984 = vmatprep.subr.mxu1 %v4655_v8  ;;  %3981 = vmatprep.mubr.msk.f32.mxu0 %vm4656_vm1, %v4655_v8 }
 0x3e3   :  { %3977 = vmatmul.mubr.msk.f32.vlgmr.msra.gmra.mrb[8].mxu1 %vm242_vm2, %v647_v43 }
 0x3e4   :  { %3986 = vmatprep.mubr.msk.f32.mxu1 %vm4656_vm1, %v4655_v8 }
 0x4ae   :  { %v4957_v44 = vpop.f32.mrb[0].mxu0 }
 0x4af   :  { %v3963_v45 = vpop.f32.mrb[1].mxu0 }
 0x4b2   :  { %v4959_v46 = vpop.f32.mrb[6].mxu1  ;;  %v642_v47 = vpop.f32.mrb[2].mxu0 }
 0x4b3   :  { %v3968_v48 = vpop.f32.mrb[7].mxu1  ;;  %v3973_v49 = vpop.f32.mrb[3].mxu0  ;;  %v724_v50 = vsel %vm242_vm2, %v642_v47, -inf }
 0x4b4   :  { %725 = vmax.xlane.f32.xlu1 %v724_v50 }
 0x4b6   :  { %v720_v51 = vpop.f32.mrb[8].mxu1 }
 0x4b7   :  { %v3978_v52 = vpop.f32.mrb[9].mxu1  ;;  %v727_v53 = vsel %vm242_vm2, %v720_v51, -inf }
 0x4b8   :  { %728 = vmax.xlane.f32.xlu0 %v727_v53 }
 0x4c5   :  { %746 = vrot.lane.b32.xlu1 %v4905_v12, %s4661_s8 }
 0x4c9   :  { %900 = vrot.lane.b32.xlu1 %v4905_v12, %s4662_s0 }
 0x4cd   :  { %978 = vrot.lane.b32.xlu1 %v4909_v13, %s4662_s0 }
 0x4ce   :  { %822 = vrot.lane.b32.xlu0 %v4909_v13, %s4661_s8 }
 0x4d2   :  { %898 = vrot.lane.b32.xlu0 %v4905_v12, %s4663_s1 }
 0x541   :  { %v726_v54 = vpop.xlane.xlu1 %725 }
 0x542   :  { %v730_v55 = vsub.f32 %v642_v47, %v726_v54 }
 0x544   :  { %v732_v56 = vmul.f32 1.442695, %v730_v55 }
 0x545   :  { %v747_v57 = vpop.permute.xlu1 %746  ;;  %v729_v58 = vpop.xlane.xlu0 %728 }
 0x546   :  { %4440 = vpow2.f32 %v732_v56  ;;  %v731_v59 = vsub.f32 %v720_v51, %v729_v58  ;;  %3980 = vmatpush3.msra.mxu0 %v747_v57 }
 0x547   :  { %3989 = vmatprep.subr.mxu0 %v4655_v8 }
 0x548   :  { %v734_v60 = vmul.f32 1.442695, %v731_v59 }
 0x549   :  { %v823_v61 = vpop.permute.xlu0 %822  ;;  %v901_v2 = vpop.permute.xlu1 %900 }
 0x54a   :  { %4442 = vpow2.f32 %v734_v60  ;;  %3985 = vmatpush3.msra.mxu1 %v823_v61 }
 0x54b   :  { %3994 = vmatprep.subr.mxu1 %v4655_v8 }
 0x54d   :  { %v979_v3 = vpop.permute.xlu1 %978  ;;  %v899_v15 = vpop.permute.xlu0 %898 }
 0x550   :  { %v4441_v62 = vpop.eup %4440 }
 0x551   :  { %v736_v63 = vsel %vm242_vm2, %v4441_v62, 0.0 }
 0x552   :  { %737 = vadd.xlane.f32.xlu1 %v736_v63 }
 0x554   :  { %v4443_v0 = vpop.eup %4442 }
 0x555   :  { %v739_v1 = vsel %vm242_vm2, %v4443_v0, 0.0 }
 0x556   :  { %740 = vadd.xlane.f32.xlu1 %v739_v1 }
 0x567   :  { %976 = vrot.lane.b32.xlu1 %v4909_v13, %s4663_s1 }
 0x5df   :  { %v738_v4 = vpop.xlane.xlu1 %737 }
 0x5e0   :  { %4444 = vrcp.f32 %v738_v4 }
 0x5e3   :  { %v741_v6 = vpop.xlane.xlu1 %740 }
 0x5e4   :  { %4446 = vrcp.f32 %v741_v6 }
 0x5e7   :  { %v977_v16 = vpop.permute.xlu1 %976 }
 0x5ea   :  { %v4445_v9 = vpop.eup %4444 }
 0x5eb   :  { %v743_v10 = vmul.f32 %v4445_v9, %v4441_v62 }
 0x5ed   :  { %3982 = vmatmul.mubr.msk.f32.vlgmr.msra.gmra.mrb[4].mxu0 %vm242_vm2, %v743_v10 }
 0x5ee   :  { %v4447_v11 = vpop.eup %4446  ;;  %3990 = vmatpush3.xpose.msk.msra.mxu0 %vm242_vm2, %v901_v2  ;;  %3991 = vmatprep.mubr.msk.f32.mxu0 %vm4656_vm1, %v4655_v8 }
 0x5ef   :  { %v745_v14 = vmul.f32 %v4447_v11, %v4443_v0  ;;  %3999 = vmatprep.subr.mxu0 %v4655_v8 }
 0x5f1   :  { %3987 = vmatmul.mubr.msk.f32.vlgmr.msra.gmra.mrb[10].mxu1 %vm242_vm2, %v745_v14  ;;  %3992 = vmatmul.mubr.msk.f32.vlgmr.msra.gmra.mrb[6].mxu0 %vm242_vm2, %v899_v15 }
 0x5f2   :  { %3995 = vmatpush3.xpose.msk.msra.mxu1 %vm242_vm2, %v979_v3  ;;  %3996 = vmatprep.mubr.msk.f32.mxu1 %vm4656_vm1, %v4655_v8 }
 0x5f3   :  { %4004 = vmatprep.subr.mxu1 %v4655_v8  ;;  %4001 = vmatprep.mubr.msk.f32.mxu0 %vm4656_vm1, %v4655_v8 }
 0x5f5   :  { %3997 = vmatmul.mubr.msk.f32.vlgmr.msra.gmra.mrb[12].mxu1 %vm242_vm2, %v977_v16 }
 0x5f6   :  { %4006 = vmatprep.mubr.msk.f32.mxu1 %vm4656_vm1, %v4655_v8 }
 0x6c0   :  { %v4993_v17 = vpop.f32.mrb[4].mxu0 }
 0x6c1   :  { %v3983_v18 = vpop.f32.mrb[5].mxu0 }
 0x6c4   :  { %v4995_v19 = vpop.f32.mrb[10].mxu1  ;;  %v972_v20 = vpop.f32.mrb[6].mxu0 }
 0x6c5   :  { %v3988_v21 = vpop.f32.mrb[11].mxu1  ;;  %v3993_v22 = vpop.f32.mrb[7].mxu0  ;;  %v1054_v23 = vsel %vm242_vm2, %v972_v20, -inf }
 0x6c6   :  { %1055 = vmax.xlane.f32.xlu0 %v1054_v23  ;;  %v1592_v21 = vld [vmem:[%s5406_s26 + $0x10] sm:$0xff]  ;;  %v1593_v22 = vld [vmem:[%s5406_s26 + $0x18] sm:$0xff] }
 0x6c7   :  { %v4230_v23 = vpack.c.bf16 %v1593_v22, %v1592_v21  ;;  %v3756_v22 = vld [vmem:[%s5381_s17] ss:$0 sm:$0xff] }
 0x6c8   :  { %v1050_v24 = vpop.f32.mrb[12].mxu1 }
 0x6c9   :  { %v3998_v25 = vpop.f32.mrb[13].mxu1  ;;  %v1057_v26 = vsel %vm242_vm2, %v1050_v24, -inf }
 0x6ca   :  { %1058 = vmax.xlane.f32.xlu1 %v1057_v26 }
 0x6db   :  { %1076 = vrot.lane.b32.xlu1 %v4905_v12, %s4664_s5 }
 0x6dc   :  { %1152 = vrot.lane.b32.xlu0 %v4909_v13, %s4664_s5 }
 0x6df   :  { %1230 = vrot.lane.b32.xlu1 %v4905_v12, %s4665_s6 }
 0x6e3   :  { %1308 = vrot.lane.b32.xlu1 %v4909_v13, %s4665_s6 }
 0x6e7   :  { %1306 = vrot.lane.b32.xlu1 %v4909_v13, %s4666_s29 }
 0x753   :  { %v1056_v27 = vpop.xlane.xlu0 %1055 }
 0x754   :  { %v1060_v28 = vsub.f32 %v972_v20, %v1056_v27 }
 0x756   :  { %v1062_v29 = vmul.f32 1.442695, %v1060_v28 }
 0x757   :  { %v1059_v30 = vpop.xlane.xlu1 %1058  ;;  %v1153_v31 = vpop.permute.xlu0 %1152 }
 0x758   :  { %4448 = vpow2.f32 %v1062_v29  ;;  %v1061_v32 = vsub.f32 %v1050_v24, %v1059_v30  ;;  %4005 = vmatpush3.msra.mxu1 %v1153_v31 }
 0x759   :  { %4014 = vmatprep.subr.mxu1 %v4655_v8 }
 0x75a   :  { %v1064_v33 = vmul.f32 1.442695, %v1061_v32 }
 0x75b   :  { %v1077_v34 = vpop.permute.xlu1 %1076 }
 0x75c   :  { %4450 = vpow2.f32 %v1064_v33  ;;  %4000 = vmatpush3.msra.mxu0 %v1077_v34 }
 0x75d   :  { %4009 = vmatprep.subr.mxu0 %v4655_v8 }
 0x75f   :  { %v1231_v41 = vpop.permute.xlu1 %1230 }
 0x762   :  { %v4449_v35 = vpop.eup %4448 }
 0x763   :  { %v1066_v36 = vsel %vm242_vm2, %v4449_v35, 0.0  ;;  %v1309_v47 = vpop.permute.xlu1 %1308 }
 0x764   :  { %1067 = vadd.xlane.f32.xlu0 %v1066_v36 }
 0x766   :  { %v4451_v37 = vpop.eup %4450 }
 0x767   :  { %v1069_v38 = vsel %vm242_vm2, %v4451_v37, 0.0  ;;  %v1307_v50 = vpop.permute.xlu1 %1306 }
 0x768   :  { %1070 = vadd.xlane.f32.xlu0 %v1069_v38 }
 0x77e   :  { %1228 = vrot.lane.b32.xlu0 %v4905_v12, %s4666_s29 }
 0x7f1   :  { %v1068_v39 = vpop.xlane.xlu0 %1067 }
 0x7f2   :  { %4452 = vrcp.f32 %v1068_v39 }
 0x7f5   :  { %v1071_v40 = vpop.xlane.xlu0 %1070 }
 0x7f6   :  { %4454 = vrcp.f32 %v1071_v40 }
 0x7f9   :  { %v1229_v49 = vpop.permute.xlu0 %1228 }
 0x7fc   :  { %v4453_v42 = vpop.eup %4452 }
 0x7fd   :  { %v1073_v43 = vmul.f32 %v4453_v42, %v4449_v35 }
 0x7ff   :  { %4002 = vmatmul.mubr.msk.f32.vlgmr.msra.gmra.mrb[8].mxu0 %vm242_vm2, %v1073_v43 }
 0x800   :  { %v4455_v45 = vpop.eup %4454  ;;  %4010 = vmatpush3.xpose.msk.msra.mxu0 %vm242_vm2, %v1231_v41  ;;  %4011 = vmatprep.mubr.msk.f32.mxu0 %vm4656_vm1, %v4655_v8 }
 0x801   :  { %v1075_v48 = vmul.f32 %v4455_v45, %v4451_v37  ;;  %4019 = vmatprep.subr.mxu0 %v4655_v8 }
 0x803   :  { %4007 = vmatmul.mubr.msk.f32.vlgmr.msra.gmra.mrb[14].mxu1 %vm242_vm2, %v1075_v48  ;;  %4012 = vmatmul.mubr.msk.f32.vlgmr.msra.gmra.mrb[10].mxu0 %vm242_vm2, %v1229_v49 }
 0x804   :  { %4015 = vmatpush3.xpose.msk.msra.mxu1 %vm242_vm2, %v1309_v47  ;;  %4016 = vmatprep.mubr.msk.f32.mxu1 %vm4656_vm1, %v4655_v8 }
 0x805   :  { %4024 = vmatprep.subr.mxu1 %v4655_v8  ;;  %4021 = vmatprep.mubr.msk.f32.mxu0 %vm4656_vm1, %v4655_v8 }
 0x807   :  { %4017 = vmatmul.mubr.msk.f32.vlgmr.msra.gmra.mrb[16].mxu1 %vm242_vm2, %v1307_v50 }
 0x808   :  { %4026 = vmatprep.mubr.msk.f32.mxu1 %vm4656_vm1, %v4655_v8 }
 0x8d2   :  { %v1148_v51 = vpop.f32.mrb[8].mxu0 }
 0x8d3   :  { %v4003_v52 = vpop.f32.mrb[9].mxu0 }
 0x8d6   :  { %v1224_v53 = vpop.f32.mrb[14].mxu1  ;;  %v1302_v54 = vpop.f32.mrb[10].mxu0 }
 0x8d7   :  { %v4008_v55 = vpop.f32.mrb[15].mxu1  ;;  %v4013_v56 = vpop.f32.mrb[11].mxu0  ;;  %v1384_v57 = vsel %vm242_vm2, %v1302_v54, -inf }
 0x8d8   :  { %1385 = vmax.xlane.f32.xlu0 %v1384_v57 }
 0x8da   :  { %v1380_v58 = vpop.f32.mrb[16].mxu1 }
 0x8db   :  { %v4018_v59 = vpop.f32.mrb[17].mxu1  ;;  %v1387_v60 = vsel %vm242_vm2, %v1380_v58, -inf }
 0x8dc   :  { %1388 = vmax.xlane.f32.xlu1 %v1387_v60  ;;  %v1823_v60 = vld [vmem:[#allocation7 + $0x10] sm:$0xff] }
 0x8ed   :  { %1406 = vrot.lane.b32.xlu1 %v4905_v12, %s4667_s24 }
 0x8f1   :  { %1560 = vrot.lane.b32.xlu1 %v4993_v17, %s4651_s27 }
 0x8f5   :  { %1562 = vrot.lane.b32.xlu1 %v4995_v19, %s4651_s27  ;;  %v1591_v19 = vld [vmem:[%s5406_s26 + $0x8] sm:$0xff] }
 0x8f9   :  { %1570 = vrot.lane.b32.xlu1 %v1224_v53, %s4668_s25 }
 0x965   :  { %v1386_v61 = vpop.xlane.xlu0 %1385 }
 0x966   :  { %v1390_v62 = vsub.f32 %v1302_v54, %v1386_v61  ;;  %v1824_v61 = vld [vmem:[#allocation7 + $0x18] sm:$0xff] }
 0x968   :  { %v1392_v63 = vmul.f32 1.442695, %v1390_v62  ;;  %v4246_v62 = vpack.c.bf16 %v1824_v61, %v1823_v60 }
 0x969   :  { %v1389_v0 = vpop.xlane.xlu1 %1388 }
 0x96a   :  { %4456 = vpow2.f32 %v1392_v63  ;;  %v1391_v1 = vsub.f32 %v1380_v58, %v1389_v0  ;;  %v1822_v58 = vld [vmem:[#allocation7 + $0x8] sm:$0xff]  ;;  %v142_v63 = vld [vmem:[%s5408_s23] sm:$0xff]  ;;  %v143_v0 = vld [vmem:[%s5408_s23 + $0x8] sm:$0xff] }
 0x96c   :  { %v1394_v2 = vmul.f32 1.442695, %v1391_v1  ;;  %v144_v1 = vld [vmem:[%s5408_s23 + $0x10] sm:$0xff] }
 0x96d   :  { %v1407_v3 = vpop.permute.xlu1 %1406 }
 0x96e   :  { %4458 = vpow2.f32 %v1394_v2  ;;  %4020 = vmatpush3.msra.mxu0 %v1407_v3  ;;  %v145_v2 = vld [vmem:[%s5408_s23 + $0x18] sm:$0xff]  ;;  %v1729_v3 = vld [vmem:[#allocation5] sm:$0xff] }
 0x971   :  { %v1561_v28 = vpop.permute.xlu1 %1560 }
 0x972   :  { %v1582_v31 = vsel %vm242_vm2, %v4957_v44, %v1561_v28 }
 0x974   :  { %v4457_v12 = vpop.eup %4456 }
 0x975   :  { %v1396_v4 = vsel %vm242_vm2, %v4457_v12, 0.0  ;;  %v1563_v29 = vpop.permute.xlu1 %1562 }
 0x976   :  { %1397 = vadd.xlane.f32.xlu0 %v1396_v4  ;;  %v1583_v36 = vsel %vm242_vm2, %v4959_v46, %v1563_v29  ;;  %v3760_v29 = vld [vmem:[%s5373_s9] ss:$0 sm:$0xff] }
 0x978   :  { %v4459_v6 = vpop.eup %4458 }
 0x979   :  { %v1399_v9 = vsel %vm242_vm2, %v4459_v6, 0.0  ;;  %v1571_v32 = vpop.permute.xlu1 %1570 }
 0x97a   :  { %1400 = vadd.xlane.f32.xlu0 %v1399_v9  ;;  %v1586_v37 = vsel %vm1584_vm4, %v1583_v36, %v1571_v32  ;;  %v1732_v9 = vld [vmem:[#allocation5 + $0x18] sm:$0xff] }
 0x990   :  { %1482 = vrot.lane.b32.xlu0 %v4909_v13, %s4667_s24  ;;  %v1590_v13 = vld [vmem:[%s5406_s26] sm:$0xff]  ;;  %s4669_s24 = smov 24   ;;  %s5407_s26 = sld [smem:[#allocation21_spill]] }
 0x991   :  { %v4226_v20 = vpack.c.bf16 %v1591_v19, %v1590_v13 }
 0x993   :  { %4227 = vmatprep.subr.bf16.mxu0 %v4226_v20 }
 0x994   :  { %1568 = vrot.lane.b32.xlu0 %v1148_v51, %s4668_s25 }
 0x996   :  { %v3752_v44 = vld [vmem:[%s5407_s26] ss:$0 sm:$0xff] }
 0xa03   :  { %v1398_v10 = vpop.xlane.xlu0 %1397 }
 0xa04   :  { %4460 = vrcp.f32 %v1398_v10 }
 0xa07   :  { %v1401_v11 = vpop.xlane.xlu0 %1400 }
 0xa08   :  { %4462 = vrcp.f32 %v1401_v11  ;;  %v4670_v11 = vmov 0.0|0.0  }
 0xa0b   :  { %v1483_v14 = vpop.permute.xlu0 %1482 }
 0xa0c   :  { %4025 = vmatpush3.msra.mxu1 %v1483_v14 }
 0xa0e   :  { %v4461_v15 = vpop.eup %4460 }
 0xa0f   :  { %v1403_v16 = vmul.f32 %v4461_v15, %v4457_v12  ;;  %v1569_v30 = vpop.permute.xlu0 %1568  ;;  %v1730_v12 = vld [vmem:[#allocation5 + $0x8] sm:$0xff] }
 0xa10   :  { %v1585_v33 = vsel %vm1584_vm4, %v1582_v31, %v1569_v30  ;;  %v4234_v4 = vpack.c.bf16 %v1730_v12, %v1729_v3 }
 0xa11   :  { %4022 = vmatmul.mubr.msk.f32.vlgmr.msra.gmra.mrb[12].mxu0 %vm242_vm2, %v1403_v16 }
 0xa12   :  { %v4463_v17 = vpop.eup %4462  ;;  %4229 = vmatpush3.bf16.msra.mxu0 %v4226_v20  ;;  %4235 = vmatprep.subr.bf16.mxu1 %v4234_v4  ;;  %v3755_v20 = vld [vmem:[%s5380_s16] ss:$0 sm:$0xff] }
 0xa13   :  { %v1405_v18 = vmul.f32 %v4463_v17, %v4459_v6  ;;  %4231 = vmatprep.subr.bf16.mxu0 %v4230_v23  ;;  %v1731_v6 = vld [vmem:[#allocation5 + $0x10] sm:$0xff] }
 0xa14   :  { %v4238_v10 = vpack.c.bf16 %v1732_v9, %v1731_v6 }
 0xa15   :  { %4027 = vmatmul.mubr.msk.f32.vlgmr.msra.gmra.mrb[18].mxu1 %vm242_vm2, %v1405_v18 }
 0xa16   :  { %4233 = vmatpush3.bf16.msra.mxu0 %v4230_v23  ;;  %4237 = vmatpush3.bf16.msra.mxu1 %v4234_v4 }
 0xa17   :  { %4239 = vmatprep.subr.bf16.mxu1 %v4238_v10 }
 0xa1a   :  { %4241 = vmatpush3.bf16.msra.mxu1 %v4238_v10 }
 0xa1b   :  { %4250 = vmatprep.subr.bf16.mxu1 %v4670_v11 }
 0xae4   :  { %v1478_v24 = vpop.f32.mrb[12].mxu0 }
 0xae5   :  { %1576 = vrot.lane.b32.xlu0 %v1478_v24, %s4669_s24  ;;  %v4023_v25 = vpop.f32.mrb[13].mxu0 }
 0xae8   :  { %v1554_v26 = vpop.f32.mrb[18].mxu1 }
 0xae9   :  { %1578 = vrot.lane.b32.xlu1 %v1554_v26, %s4669_s24  ;;  %v4028_v27 = vpop.f32.mrb[19].mxu1 }
 0xb57   :  { %v1577_v34 = vpop.permute.xlu0 %1576 }
 0xb58   :  { %v1588_v35 = vsel %vm1587_vm3, %v1585_v33, %v1577_v34 }
 0xb59   :  { %4037 = vmatprep.mubr.msk.f32.mxu0 %vm157_vm0, %v1588_v35 }
 0xb5b   :  { %v1579_v38 = vpop.permute.xlu1 %1578 }
 0xb5c   :  { %v1589_v39 = vsel %vm1587_vm3, %v1586_v37, %v1579_v38 }
 0xb5d   :  { %4038 = vmatmul.mubr.msk.f32.vlgmr.msra.gmra.mrb[14].mxu0 %vm157_vm0, %v1589_v39 }
 0xb5e   :  { %4059 = vmatprep.mubr.msk.f32.mxu0 %vm157_vm0, %v142_v63 }
 0xc30   :  { %v4039_v40 = vpop.f32.mrb[14].mxu0 }
 0xc31   :  { %v1679_v41 = vadd.f32 %v4039_v40, %v3752_v44  ;;  %v1673_v42 = vpop.f32.mrb[15].mxu0 }
 0xc32   :  { %v1674_v43 = vadd.f32 %v3752_v44, %v1673_v42  ;;  %v3757_v42 = vld [vmem:[%s5371_s7] ss:$0 sm:$0xff] }
 0xc33   :  { %v1685_v45 = vadd.f32 %v1679_v41, %v4892_v7 }
 0xc34   :  { %v1684_v47 = vadd.f32 %v1674_v43, %v4888_v5  ;;  %v1821_v5 = vld [vmem:[#allocation7] sm:$0xff] }
 0xc35   :  { %v1689_v46 = vsel %vm157_vm0, %v1685_v45, 0.0  ;;  %v4242_v59 = vpack.c.bf16 %v1822_v58, %v1821_v5 }
 0xc36   :  { %1690 = vadd.xlane.f32.xlu1 %v1689_v46  ;;  %v1686_v48 = vsel %vm157_vm0, %v1684_v47, 0.0 }
 0xc37   :  { %1687 = vadd.xlane.f32.xlu0 %v1686_v48  ;;  %4243 = vmatprep.subr.bf16.mxu0 %v4242_v59 }
 0xc38   :  { %4245 = vmatpush3.bf16.msra.mxu0 %v4242_v59 }
 0xc39   :  { %4247 = vmatprep.subr.bf16.mxu0 %v4246_v62 }
 0xc3c   :  { %4249 = vmatpush3.bf16.msra.mxu0 %v4246_v62 }
 0xc3d   :  { %4254 = vmatprep.subr.bf16.mxu0 %v4670_v11 }
 0xc3f   :  { %4060 = vmatmul.mubr.msk.f32.vlgmr.msra.gmra.mrb[16].mxu0 %vm157_vm0, %v143_v0 }
 0xc40   :  { %4062 = vmatprep.mubr.msk.f32.mxu0 %vm157_vm0, %v144_v1 }
 0xc43   :  { %4063 = vmatmul.mubr.msk.f32.gmra.mrb[18].mxu0 %vm157_vm0, %v145_v2 }
 0xc44   :  { %4076 = vmatprep.mubr.msk.f32.mxu0 %vm4656_vm1, %v4655_v8 }
 0xcc3   :  { %v1691_v49 = vpop.xlane.xlu1 %1690 }
 0xcc4   :  { %v1694_v50 = vmul.f32 0.03125, %v1691_v49  ;;  %v1688_v51 = vpop.xlane.xlu0 %1687 }
 0xcc5   :  { %v1693_v52 = vmul.f32 0.03125, %v1688_v51 }
 0xcc6   :  { %v1696_v53 = vsub.f32 %v1685_v45, %v1694_v50 }
 0xcc7   :  { %v1695_v54 = vsub.f32 %v1684_v47, %v1693_v52 }
 0xcc8   :  { %v1698_v57 = vmul.f32 %v1696_v53, %v1696_v53 }
 0xcc9   :  { %v1697_v55 = vmul.f32 %v1695_v54, %v1695_v54 }
 0xcca   :  { %v1702_v7 = vsel %vm157_vm0, %v1698_v57, 0.0 }
 0xccb   :  { %v1699_v56 = vsel %vm157_vm0, %v1697_v55, 0.0 }
 0xccc   :  { %1700 = vadd.xlane.f32.xlu0 %v1699_v56 }
 0xcd0   :  { %1703 = vadd.xlane.f32.xlu0 %v1702_v7 }
 0xd12   :  { %v4061_v30 = vpop.f32.mrb[16].mxu0 }
 0xd13   :  { %v1916_v31 = vadd.f32 %v4061_v30, %v3760_v29  ;;  %v1910_v32 = vpop.f32.mrb[17].mxu0 }
 0xd14   :  { %v1911_v33 = vadd.f32 %v3760_v29, %v1910_v32 }
 0xd16   :  { %v4064_v35 = vpop.f32.mrb[18].mxu0  ;;  %v4251_v36 = vpack.c.bf16 %v1916_v31, %v1911_v33  ;;  %v5124_v40 = vpack.i.bf16 %v1916_v31, %v1911_v33 }
 0xd17   :  { %v1926_v37 = vadd.f32 %v4064_v35, %v3760_v29  ;;  %v1920_v38 = vpop.f32.mrb[19].mxu0 }
 0xd18   :  { %v1921_v39 = vadd.f32 %v3760_v29, %v1920_v38 }
 0xd1a   :  { %v4255_v44 = vpack.c.bf16 %v1926_v37, %v1921_v39  ;;  %v5129_v41 = vpack.i.bf16 %v1926_v37, %v1921_v39 }
 0xd1c   :  { %4257 = vmatpush3.bf16.xpose.msk.msra.mxu0 %vm5117_vm5, %v4255_v44 }
 0xd1d   :  { %4264 = vmatprep.subr.bf16.mxu0 %v4670_v11 }
 0xd59   :  { %v1701_v14 = vpop.xlane.xlu0 %1700 }
 0xd5a   :  { %v1705_v15 = vmul.f32 0.03125, %v1701_v14 }
 0xd5c   :  { %v1707_v16 = vadd.f32 1e-05, %v1705_v15 }
 0xd5d   :  { %v1704_v17 = vpop.xlane.xlu0 %1703 }
 0xd5e   :  { %4464 = vrsqrt.f32 %v1707_v16  ;;  %v1706_v18 = vmul.f32 0.03125, %v1704_v17 }
 0xd60   :  { %v1708_v13 = vadd.f32 1e-05, %v1706_v18 }
 0xd62   :  { %4466 = vrsqrt.f32 %v1708_v13 }
 0xd68   :  { %v4465_v19 = vpop.eup %4464 }
 0xd69   :  { %v1711_v21 = vmul.f32 %v4465_v19, %v1695_v54 }
 0xd6b   :  { %v1719_v23 = vmul.f32 %v3755_v20, %v1711_v21 }
 0xd6c   :  { %v4467_v24 = vpop.eup %4466 }
 0xd6d   :  { %v1712_v25 = vmul.f32 %v4467_v24, %v1696_v53  ;;  %v5102_v26 = vadd.f32 %v3756_v22, %v1719_v23 }
 0xd6f   :  { %v1720_v27 = vmul.f32 %v3755_v20, %v1712_v25  ;;  %4048 = vmatprep.mubr.msk.f32.mxu1 %vm157_vm0, %v5102_v26 }
 0xd71   :  { %v5106_v28 = vadd.f32 %v3756_v22, %v1720_v27 }
 0xd73   :  { %4049 = vmatmul.mubr.msk.f32.vlgmr.msra.gmra.mrb[20].mxu1 %vm157_vm0, %v5106_v28 }
 0xd74   :  { %4069 = vmatprep.mubr.msk.f32.mxu1 %vm4656_vm1, %v4655_v8  ;;  %4253 = vmatpush3.bf16.xpose.msk.msra.mxu1 %vm5117_vm5, %v4251_v36 }
 0xd75   :  { %4258 = vmatprep.subr.bf16.mxu1 %v4670_v11 }
 0xe46   :  { %v4050_v43 = vpop.f32.mrb[20].mxu1 }
 0xe47   :  { %v5134_v45 = vadd.f32 %v4050_v43, %v3757_v42  ;;  %v1812_v47 = vpop.f32.mrb[21].mxu1 }
 0xe48   :  { %v5136_v46 = vadd.f32 %v3757_v42, %v1812_v47 }
 0xe49   :  { %4077 = vmatmul.mubr.msk.f32.vlgmr.msra.gmra.mrb[20].mxu0 %vm242_vm2, %v5134_v45 }
 0xe4a   :  { %4070 = vmatmul.mubr.msk.f32.vlgmr.msra.gmra.mrb[22].mxu1 %vm242_vm2, %v5136_v46  ;;  %4097 = vmatprep.mubr.msk.f32.mxu0 %vm4656_vm1, %v4655_v8 }
 0xe4b   :  { %4083 = vmatprep.mubr.msk.f32.mxu1 %vm4656_vm1, %v4655_v8 }
 0xf1c   :  { %v2083_v48 = vpop.f32.mrb[20].mxu0 }
 0xf1d   :  { %v2004_v49 = vpop.f32.mrb[22].mxu1  ;;  %v4078_v50 = vpop.f32.mrb[21].mxu0  ;;  %v2090_v51 = vsel %vm1584_vm4, %v2083_v48, -inf }
 0xf1e   :  { %2091 = vmax.xlane.f32.xlu0 %v2090_v51  ;;  %v4071_v52 = vpop.f32.mrb[23].mxu1  ;;  %v2087_v53 = vsel %vm1584_vm4, %v2004_v49, -inf }
 0xf1f   :  { %2088 = vmax.xlane.f32.xlu1 %v2087_v53 }
 0xf30   :  { %4363 = vrot.lane.b32.xlu1 %v5124_v40, %s4657_s3 }
 0xf34   :  { %4373 = vrot.lane.b32.xlu1 %v5124_v40, %s4660_s4 }
 0xfab   :  { %v2092_v54 = vpop.xlane.xlu0 %2091 }
 0xfac   :  { %v2094_v55 = vsub.f32 %v2083_v48, %v2092_v54  ;;  %v2089_v56 = vpop.xlane.xlu1 %2088 }
 0xfad   :  { %v2093_v57 = vsub.f32 %v2004_v49, %v2089_v56 }
 0xfae   :  { %v2097_v7 = vmul.f32 1.442695, %v2094_v55 }
 0xfaf   :  { %v2095_v5 = vmul.f32 1.442695, %v2093_v57 }
 0xfb0   :  { %4468 = vpow2.f32 %v2097_v7  ;;  %v4364_v58 = vpop.permute.xlu1 %4363 }
 0xfb1   :  { %4470 = vpow2.f32 %v2095_v5  ;;  %v4366_v59 = vunpack.i.h.bf16 %v4364_v58  ;;  %v4365_v60 = vunpack.i.l.bf16 %v4364_v58 }
 0xfb3   :  { %v4259_v61 = vpack.c.bf16 %v4366_v59, %v4365_v60 }
 0xfb4   :  { %v4374_v62 = vpop.permute.xlu1 %4373 }
 0xfb5   :  { %v4376_v63 = vunpack.i.h.bf16 %v4374_v62  ;;  %v4375_v0 = vunpack.i.l.bf16 %v4374_v62  ;;  %4260 = vmatpush3.bf16.msra.mxu1 %v4259_v61 }
 0xfb6   :  { %4261 = vmatprep.subr.bf16.mxu1 %v4670_v11 }
 0xfb7   :  { %v4265_v1 = vpack.c.bf16 %v4376_v63, %v4375_v0 }
 0xfb9   :  { %4267 = vmatpush3.bf16.xpose.msk.msra.mxu0 %vm5117_vm5, %v4265_v1 }
 0xfba   :  { %v4469_v2 = vpop.eup %4468  ;;  %4272 = vmatprep.subr.bf16.mxu0 %v4670_v11 }
 0xfbb   :  { %v4471_v3 = vpop.eup %4470  ;;  %v2102_v12 = vsel %vm1584_vm4, %v4469_v2, 0.0 }
 0xfbc   :  { %2103 = vadd.xlane.f32.xlu0 %v2102_v12  ;;  %v2099_v4 = vsel %vm1584_vm4, %v4471_v3, 0.0 }
 0xfbd   :  { %2100 = vadd.xlane.f32.xlu1 %v2099_v4 }
 0xfce   :  { %4378 = vrot.lane.b32.xlu1 %v5129_v41, %s4660_s4 }
 0xfd2   :  { %4368 = vrot.lane.b32.xlu0 %v5129_v41, %s4657_s3  ;;  %2349 = vrot.lane.b32.xlu1 %v5134_v45, %s4660_s4 }
 0xfd6   :  { %2267 = vrot.lane.b32.xlu0 %v5136_v46, %s4660_s4 }
0x1049   :  { %v2104_v6 = vpop.xlane.xlu0 %2103 }
0x104a   :  { %v2101_v9 = vpop.xlane.xlu1 %2100 }
0x104b   :  { %4472 = vrcp.f32 %v2101_v9 }
0x104c   :  { %4474 = vrcp.f32 %v2104_v6 }
0x104d   :  { %v4369_v10 = vpop.permute.xlu0 %4368 }
0x104e   :  { %v4371_v15 = vunpack.i.h.bf16 %v4369_v10  ;;  %v4370_v16 = vunpack.i.l.bf16 %v4369_v10  ;;  %v4379_v20 = vpop.permute.xlu1 %4378 }
0x104f   :  { %v4381_v22 = vunpack.i.h.bf16 %v4379_v20  ;;  %v4380_v23 = vunpack.i.l.bf16 %v4379_v20 }
0x1050   :  { %v4262_v19 = vpack.c.bf16 %v4371_v15, %v4370_v16 }
0x1051   :  { %v2268_v14 = vpop.permute.xlu0 %2267  ;;  %v4269_v24 = vpack.c.bf16 %v4381_v22, %v4380_v23 }
0x1052   :  { %4098 = vmatmul.mubr.msk.f32.vlgmr.msra.gmra.mrb[22].mxu0 %vm242_vm2, %v2268_v14  ;;  %v2350_v25 = vpop.permute.xlu1 %2349 }
0x1053   :  { %4111 = vmatprep.mubr.msk.f32.mxu0 %vm4656_vm1, %v4655_v8 }
0x1055   :  { %v4473_v17 = vpop.eup %4472 }
0x1056   :  { %v2106_v18 = vmul.f32 %v4473_v17, %v4471_v3  ;;  %v4475_v13 = vpop.eup %4474 }
0x1057   :  { %v2108_v21 = vmul.f32 %v4475_v13, %v4469_v2 }
0x1058   :  { %4084 = vmatmul.mubr.msk.f32.vlgmr.msra.gmra.mrb[24].mxu1 %vm1584_vm4, %v2106_v18 }
0x1059   :  { %4263 = vmatpush3.bf16.msra.mxu1 %v4262_v19  ;;  %4090 = vmatprep.mubr.msk.f32.mxu1 %vm4656_vm1, %v4655_v8 }
0x105a   :  { %4268 = vmatprep.subr.bf16.mxu1 %v4670_v11 }
0x105c   :  { %4091 = vmatmul.mubr.msk.f32.vlgmr.msra.gmra.mrb[26].mxu1 %vm1584_vm4, %v2108_v21 }
0x105d   :  { %4104 = vmatprep.mubr.msk.f32.mxu1 %vm4656_vm1, %v4655_v8 }
0x1062   :  { %4271 = vmatpush3.bf16.xpose.msk.msra.mxu1 %vm5117_vm5, %v4269_v24 }
0x1063   :  { %4275 = vmatprep.subr.bf16.mxu1 %v4670_v11 }
0x1069   :  { %4105 = vmatmul.mubr.msk.f32.vlgmr.msra.gmra.mrb[28].mxu1 %vm242_vm2, %v2350_v25 }
0x106a   :  { %4118 = vmatprep.mubr.msk.f32.mxu1 %vm4656_vm1, %v4655_v8 }
0x1125   :  { %v2345_v27 = vpop.f32.mrb[22].mxu0 }
0x1126   :  { %v4099_v29 = vpop.f32.mrb[23].mxu0  ;;  %v2431_v30 = vsel %vm1584_vm4, %v2345_v27, -inf }
0x1127   :  { %2432 = vmax.xlane.f32.xlu0 %v2431_v30 }
0x112b   :  { %v5183_v31 = vpop.f32.mrb[24].mxu1 }
0x112c   :  { %v4085_v32 = vpop.f32.mrb[25].mxu1 }
0x112f   :  { %v5185_v33 = vpop.f32.mrb[26].mxu1 }
0x1130   :  { %v4092_v35 = vpop.f32.mrb[27].mxu1 }
0x113c   :  { %v2427_v36 = vpop.f32.mrb[28].mxu1 }
0x113d   :  { %v4106_v37 = vpop.f32.mrb[29].mxu1  ;;  %v2434_v38 = vsel %vm1584_vm4, %v2427_v36, -inf }
0x113e   :  { %2435 = vmax.xlane.f32.xlu1 %v2434_v38 }
0x114f   :  { %4383 = vrot.lane.b32.xlu1 %v5124_v40, %s4659_s22 }
0x1153   :  { %4393 = vrot.lane.b32.xlu1 %v5124_v40, %s4663_s1 }
0x1157   :  { %4398 = vrot.lane.b32.xlu1 %v5129_v41, %s4663_s1 }
0x115b   :  { %2693 = vrot.lane.b32.xlu1 %v5134_v45, %s4663_s1 }
0x11b4   :  { %v2433_v39 = vpop.xlane.xlu0 %2432 }
0x11b5   :  { %v2437_v44 = vsub.f32 %v2345_v27, %v2433_v39 }
0x11b7   :  { %v2439_v42 = vmul.f32 1.442695, %v2437_v44 }
0x11b9   :  { %4476 = vpow2.f32 %v2439_v42 }
0x11c3   :  { %v4477_v43 = vpop.eup %4476 }
0x11c4   :  { %v2443_v47 = vsel %vm1584_vm4, %v4477_v43, 0.0 }
0x11c5   :  { %2444 = vadd.xlane.f32.xlu0 %v2443_v47 }
0x11cb   :  { %v2436_v48 = vpop.xlane.xlu1 %2435 }
0x11cc   :  { %v2438_v49 = vsub.f32 %v2427_v36, %v2436_v48 }
0x11ce   :  { %v2441_v50 = vmul.f32 1.442695, %v2438_v49 }
0x11cf   :  { %v4384_v51 = vpop.permute.xlu1 %4383 }
0x11d0   :  { %4478 = vpow2.f32 %v2441_v50  ;;  %v4386_v52 = vunpack.i.h.bf16 %v4384_v51  ;;  %v4385_v53 = vunpack.i.l.bf16 %v4384_v51 }
0x11d2   :  { %v4273_v54 = vpack.c.bf16 %v4386_v52, %v4385_v53 }
0x11d3   :  { %v4394_v7 = vpop.permute.xlu1 %4393 }
0x11d4   :  { %4274 = vmatpush3.bf16.msra.mxu0 %v4273_v54  ;;  %v4396_v5 = vunpack.i.h.bf16 %v4394_v7  ;;  %v4395_v58 = vunpack.i.l.bf16 %v4394_v7 }
0x11d5   :  { %4278 = vmatprep.subr.bf16.mxu0 %v4670_v11 }
0x11d6   :  { %v4279_v61 = vpack.c.bf16 %v4396_v5, %v4395_v58 }
0x11d7   :  { %v4399_v12 = vpop.permute.xlu1 %4398 }
0x11d8   :  { %v4401_v6 = vunpack.i.h.bf16 %v4399_v12  ;;  %v4400_v9 = vunpack.i.l.bf16 %v4399_v12 }
0x11da   :  { %v4479_v55 = vpop.eup %4478  ;;  %v4283_v14 = vpack.c.bf16 %v4401_v6, %v4400_v9 }
0x11db   :  { %v2446_v56 = vsel %vm1584_vm4, %v4479_v55, 0.0  ;;  %v2694_v15 = vpop.permute.xlu1 %2693 }
0x11dc   :  { %2447 = vadd.xlane.f32.xlu0 %v2446_v56 }
0x11f2   :  { %4388 = vrot.lane.b32.xlu0 %v5129_v41, %s4659_s22  ;;  %s4671_s22 = smov [#allocation11]  }
0x11f3   :  { %s3711_s4 = sshll.u32 %s4671_s22, 4  ;;  %s3712_s4 = int_to_ptr.vmem [resolvable:$true] %s3711_s4 }
0x11f4   :  { %p4623_p13 = scmp.lt.s32.totalorder %s3712_s4, %s3712_s4 }
0x11f6   :  { %2611 = vrot.lane.b32.xlu0 %v5136_v46, %s4663_s1 }
0x1252   :  { %v2445_v57 = vpop.xlane.xlu0 %2444 }
0x1253   :  { %4480 = vrcp.f32 %v2445_v57 }
0x125d   :  { %v4481_v59 = vpop.eup %4480 }
0x125e   :  { %v2450_v60 = vmul.f32 %v4481_v59, %v4477_v43 }
0x1260   :  { %4112 = vmatmul.mubr.msk.f32.vlgmr.msra.gmra.mrb[24].mxu0 %vm1584_vm4, %v2450_v60 }
0x1261   :  { %4281 = vmatpush3.bf16.xpose.msk.msra.mxu0 %vm5117_vm5, %v4279_v61  ;;  %4125 = vmatprep.mubr.msk.f32.mxu0 %vm4656_vm1, %v4655_v8 }
0x1262   :  { %4286 = vmatprep.subr.bf16.mxu0 %v4670_v11 }
0x1269   :  { %v2448_v62 = vpop.xlane.xlu0 %2447 }
0x126a   :  { %4482 = vrcp.f32 %v2448_v62 }
0x126d   :  { %v4389_v63 = vpop.permute.xlu0 %4388 }
0x126e   :  { %v4391_v0 = vunpack.i.h.bf16 %v4389_v63  ;;  %v4390_v1 = vunpack.i.l.bf16 %v4389_v63 }
0x1270   :  { %v4276_v2 = vpack.c.bf16 %v4391_v0, %v4390_v1 }
0x1271   :  { %v2612_v3 = vpop.permute.xlu0 %2611 }
0x1272   :  { %4277 = vmatpush3.bf16.msra.mxu1 %v4276_v2  ;;  %4126 = vmatmul.mubr.msk.f32.vlgmr.msra.gmra.mrb[26].mxu0 %vm242_vm2, %v2612_v3 }
0x1273   :  { %4282 = vmatprep.subr.bf16.mxu1 %v4670_v11  ;;  %4139 = vmatprep.mubr.msk.f32.mxu0 %vm4656_vm1, %v4655_v8 }
0x1274   :  { %v4483_v4 = vpop.eup %4482 }
0x1275   :  { %v2452_v10 = vmul.f32 %v4483_v4, %v4479_v55 }
0x1277   :  { %4119 = vmatmul.mubr.msk.f32.vlgmr.msra.gmra.mrb[30].mxu1 %vm1584_vm4, %v2452_v10 }
0x1278   :  { %4132 = vmatprep.mubr.msk.f32.mxu1 %vm4656_vm1, %v4655_v8 }
0x127b   :  { %4285 = vmatpush3.bf16.xpose.msk.msra.mxu1 %vm5117_vm5, %v4283_v14 }
0x127c   :  { %4289 = vmatprep.subr.bf16.mxu1 %v4670_v11 }
0x1282   :  { %4133 = vmatmul.mubr.msk.f32.vlgmr.msra.gmra.mrb[32].mxu1 %vm242_vm2, %v2694_v15 }
0x1283   :  { %4146 = vmatprep.mubr.msk.f32.mxu1 %vm4656_vm1, %v4655_v8 }
0x1333   :  { %v5222_v16 = vpop.f32.mrb[24].mxu0 }
0x1334   :  { %v4113_v17 = vpop.f32.mrb[25].mxu0 }
0x1345   :  { %v2689_v18 = vpop.f32.mrb[26].mxu0 }
0x1346   :  { %v4127_v13 = vpop.f32.mrb[27].mxu0  ;;  %v2775_v19 = vsel %vm1584_vm4, %v2689_v18, -inf }
0x1347   :  { %2776 = vmax.xlane.f32.xlu0 %v2775_v19 }
0x134a   :  { %v5225_v20 = vpop.f32.mrb[30].mxu1 }
0x134b   :  { %v4120_v21 = vpop.f32.mrb[31].mxu1 }
0x1355   :  { %v2771_v22 = vpop.f32.mrb[32].mxu1 }
0x1356   :  { %v4134_v23 = vpop.f32.mrb[33].mxu1  ;;  %v2778_v24 = vsel %vm1584_vm4, %v2771_v22, -inf }
0x1357   :  { %2779 = vmax.xlane.f32.xlu1 %v2778_v24 }
0x1368   :  { %4403 = vrot.lane.b32.xlu1 %v5124_v40, %s4662_s0 }
0x136c   :  { %4413 = vrot.lane.b32.xlu1 %v5124_v40, %s4666_s29 }
0x1370   :  { %4418 = vrot.lane.b32.xlu1 %v5129_v41, %s4666_s29 }
0x1374   :  { %3037 = vrot.lane.b32.xlu1 %v5134_v45, %s4666_s29 }
0x13d4   :  { %v2777_v25 = vpop.xlane.xlu0 %2776 }
0x13d5   :  { %v2781_v27 = vsub.f32 %v2689_v18, %v2777_v25 }
0x13d7   :  { %v2783_v29 = vmul.f32 1.442695, %v2781_v27 }
0x13d9   :  { %4484 = vpow2.f32 %v2783_v29 }
0x13e3   :  { %v4485_v30 = vpop.eup %4484 }
0x13e4   :  { %v2780_v32 = vpop.xlane.xlu1 %2779  ;;  %v2787_v35 = vsel %vm1584_vm4, %v4485_v30, 0.0 }
0x13e5   :  { %v2782_v36 = vsub.f32 %v2771_v22, %v2780_v32  ;;  %2788 = vadd.xlane.f32.xlu0 %v2787_v35 }
0x13e7   :  { %v2785_v37 = vmul.f32 1.442695, %v2782_v36 }
0x13e8   :  { %v4404_v38 = vpop.permute.xlu1 %4403 }
0x13e9   :  { %4486 = vpow2.f32 %v2785_v37  ;;  %v4406_v39 = vunpack.i.h.bf16 %v4404_v38  ;;  %v4405_v44 = vunpack.i.l.bf16 %v4404_v38 }
0x13eb   :  { %v4287_v42 = vpack.c.bf16 %v4406_v39, %v4405_v44  ;;  %v3330_v39 = vld [vmem:[#allocation8 + $0x8] sm:$0xff]  ;;  %v3331_v44 = vld [vmem:[#allocation8 + $0x10] sm:$0xff] }
0x13ec   :  { %v4414_v48 = vpop.permute.xlu1 %4413 }
0x13ed   :  { %4288 = vmatpush3.bf16.msra.mxu0 %v4287_v42  ;;  %v4416_v49 = vunpack.i.h.bf16 %v4414_v48  ;;  %v4415_v50 = vunpack.i.l.bf16 %v4414_v48 }
0x13ee   :  { %4292 = vmatprep.subr.bf16.mxu0 %v4670_v11 }
0x13ef   :  { %v4293_v53 = vpack.c.bf16 %v4416_v49, %v4415_v50 }
0x13f0   :  { %v4419_v5 = vpop.permute.xlu1 %4418 }
0x13f1   :  { %v4421_v59 = vunpack.i.h.bf16 %v4419_v5  ;;  %v4420_v60 = vunpack.i.l.bf16 %v4419_v5 }
0x13f3   :  { %v4487_v45 = vpop.eup %4486  ;;  %v4297_v62 = vpack.c.bf16 %v4421_v59, %v4420_v60 }
0x13f4   :  { %v2790_v43 = vsel %vm1584_vm4, %v4487_v45, 0.0  ;;  %v3038_v63 = vpop.permute.xlu1 %3037 }
0x13f5   :  { %2791 = vadd.xlane.f32.xlu0 %v2790_v43 }
0x140b   :  { %4408 = vrot.lane.b32.xlu0 %v5129_v41, %s4662_s0  ;;  %s4618_s0 = scalar_lea.vmem %s3712_s4, 256 }
0x140c   :  { %p4619_p12 = scmp.ne.s32.totalorder %s3712_s4, %s4618_s0  ;;  %p4624_p0 = scmp.lt.s32.totalorder %s4618_s0, %s4618_s0 }
0x140e   :  { %p4625_p1 = por %p4624_p0, %p4623_p13 }
0x140f   :  { %2955 = vrot.lane.b32.xlu0 %v5136_v46, %s4666_s29 }
0x1410   :  { %p4626_p2 = pnand %p4625_p1, %p4619_p12 }
0x1472   :  { %v2789_v47 = vpop.xlane.xlu0 %2788 }
0x1473   :  { %4488 = vrcp.f32 %v2789_v47 }
0x147d   :  { %v4489_v51 = vpop.eup %4488 }
0x147e   :  { %v2794_v52 = vmul.f32 %v4489_v51, %v4485_v30 }
0x1480   :  { %4140 = vmatmul.mubr.msk.f32.vlgmr.msra.gmra.mrb[28].mxu0 %vm1584_vm4, %v2794_v52 }
0x1481   :  { %4295 = vmatpush3.bf16.xpose.msk.msra.mxu0 %vm5117_vm5, %v4293_v53  ;;  %4153 = vmatprep.mubr.msk.f32.mxu0 %vm4656_vm1, %v4655_v8 }
0x1482   :  { %v2792_v54 = vpop.xlane.xlu0 %2791  ;;  %4300 = vmatprep.subr.bf16.mxu0 %v4670_v11 }
0x1483   :  { %4490 = vrcp.f32 %v2792_v54 }
0x1486   :  { %v4409_v46 = vpop.permute.xlu0 %4408 }
0x1487   :  { %v4411_v55 = vunpack.i.h.bf16 %v4409_v46  ;;  %v4410_v56 = vunpack.i.l.bf16 %v4409_v46 }
0x1489   :  { %v4290_v57 = vpack.c.bf16 %v4411_v55, %v4410_v56 }
0x148a   :  { %v2956_v7 = vpop.permute.xlu0 %2955 }
0x148b   :  { %4291 = vmatpush3.bf16.msra.mxu1 %v4290_v57  ;;  %4154 = vmatmul.mubr.msk.f32.vlgmr.msra.gmra.mrb[30].mxu0 %vm242_vm2, %v2956_v7 }
0x148c   :  { %4296 = vmatprep.subr.bf16.mxu1 %v4670_v11  ;;  %4167 = vmatprep.mubr.msk.f32.mxu0 %vm4656_vm1, %v4655_v8 }
0x148d   :  { %v4491_v58 = vpop.eup %4490 }
0x148e   :  { %v2796_v61 = vmul.f32 %v4491_v58, %v4487_v45  ;;  %v3332_v45 = vld [vmem:[#allocation8 + $0x18] sm:$0xff] }
0x148f   :  { %v4310_v43 = vpack.c.bf16 %v3332_v45, %v3331_v44 }
0x1490   :  { %4147 = vmatmul.mubr.msk.f32.vlgmr.msra.gmra.mrb[34].mxu1 %vm1584_vm4, %v2796_v61 }
0x1491   :  { %4160 = vmatprep.mubr.msk.f32.mxu1 %vm4656_vm1, %v4655_v8 }
0x1494   :  { %4299 = vmatpush3.bf16.xpose.msk.msra.mxu1 %vm5117_vm5, %v4297_v62 }
0x1495   :  { %4303 = vmatprep.subr.bf16.mxu1 %v4670_v11 }
0x149b   :  { %4161 = vmatmul.mubr.msk.f32.vlgmr.msra.gmra.mrb[36].mxu1 %vm242_vm2, %v3038_v63 }
0x149c   :  { %4174 = vmatprep.mubr.msk.f32.mxu1 %vm4656_vm1, %v4655_v8 }
0x1553   :  { %v2872_v0 = vpop.f32.mrb[28].mxu0 }
0x1554   :  { %v4141_v1 = vpop.f32.mrb[29].mxu0 }
0x155e   :  { %v3033_v2 = vpop.f32.mrb[30].mxu0 }
0x155f   :  { %v4155_v3 = vpop.f32.mrb[31].mxu0  ;;  %v3119_v12 = vsel %vm1584_vm4, %v3033_v2, -inf }
0x1560   :  { %3120 = vmax.xlane.f32.xlu0 %v3119_v12 }
0x1563   :  { %v2951_v4 = vpop.f32.mrb[34].mxu1 }
0x1564   :  { %v4148_v6 = vpop.f32.mrb[35].mxu1 }
0x156e   :  { %v3115_v9 = vpop.f32.mrb[36].mxu1 }
0x156f   :  { %v4162_v34 = vpop.f32.mrb[37].mxu1  ;;  %v3122_v10 = vsel %vm1584_vm4, %v3115_v9, -inf }
0x1570   :  { %3123 = vmax.xlane.f32.xlu1 %v3122_v10 }
0x1581   :  { %4423 = vrot.lane.b32.xlu1 %v5124_v40, %s4665_s6 }
0x1585   :  { %3301 = vrot.lane.b32.xlu1 %v5222_v16, %s4651_s27 }
0x1589   :  { %3303 = vrot.lane.b32.xlu1 %v5225_v20, %s4651_s27 }
0x158d   :  { %3311 = vrot.lane.b32.xlu1 %v2951_v4, %s4668_s25 }
0x15ed   :  { %v3121_v8 = vpop.xlane.xlu0 %3120 }
0x15ee   :  { %v3125_v11 = vsub.f32 %v3033_v2, %v3121_v8 }
0x15f0   :  { %v3127_v14 = vmul.f32 1.442695, %v3125_v11 }
0x15f2   :  { %4492 = vpow2.f32 %v3127_v14  ;;  %v3468_v14 = vld [vmem:[#allocation10 + $0x8] sm:$0xff] }
0x15fc   :  { %v4493_v15 = vpop.eup %4492 }
0x15fd   :  { %v3124_v17 = vpop.xlane.xlu1 %3123  ;;  %v3131_v18 = vsel %vm1584_vm4, %v4493_v15, 0.0 }
0x15fe   :  { %v3126_v13 = vsub.f32 %v3115_v9, %v3124_v17  ;;  %3132 = vadd.xlane.f32.xlu0 %v3131_v18  ;;  %v3469_v17 = vld [vmem:[#allocation10 + $0x10] sm:$0xff]  ;;  %v3470_v18 = vld [vmem:[#allocation10 + $0x18] sm:$0xff] }
0x1600   :  { %v3129_v19 = vmul.f32 1.442695, %v3126_v13  ;;  %v4318_v13 = vpack.c.bf16 %v3470_v18, %v3469_v17  ;;  %v3808_v17 = vld [vmem:[%s5384_s20] ss:$0 sm:$0xff] }
0x1601   :  { %v4424_v40 = vpop.permute.xlu1 %4423 }
0x1602   :  { %4494 = vpow2.f32 %v3129_v19  ;;  %v4426_v21 = vunpack.i.h.bf16 %v4424_v40  ;;  %v4425_v16 = vunpack.i.l.bf16 %v4424_v40  ;;  %v3561_v19 = vld [vmem:[%s5378_s14] sm:$0xff]  ;;  %v3562_v40 = vld [vmem:[%s5378_s14 + $0x8] sm:$0xff] }
0x1604   :  { %v4301_v22 = vpack.c.bf16 %v4426_v21, %v4425_v16  ;;  %v3563_v21 = vld [vmem:[%s5378_s14 + $0x10] sm:$0xff]  ;;  %v4322_v16 = vpack.c.bf16 %v3562_v40, %v3561_v19 }
0x1605   :  { %v3302_v51 = vpop.permute.xlu1 %3301 }
0x1606   :  { %4302 = vmatpush3.bf16.msra.mxu0 %v4301_v22  ;;  %v3323_v53 = vsel %vm242_vm2, %v5183_v31, %v3302_v51  ;;  %v3797_v31 = vld [vmem:[%s5375_s11] ss:$0 sm:$0xff]  ;;  %v3564_v22 = vld [vmem:[%s5378_s14 + $0x18] sm:$0xff]  ;;  %s5411_s11 = sld [smem:[#allocation23_spill]] }
0x1609   :  { %v3304_v56 = vpop.permute.xlu1 %3303 }
0x160a   :  { %v3324_v7 = vsel %vm242_vm2, %v5185_v33, %v3304_v56 }
0x160c   :  { %v4495_v20 = vpop.eup %4494  ;;  %v3809_v40 = vld [vmem:[%s5411_s11] ss:$0 sm:$0xff] }
0x160d   :  { %v3134_v23 = vsel %vm1584_vm4, %v4495_v20, 0.0  ;;  %v3312_v57 = vpop.permute.xlu1 %3311 }
0x160e   :  { %3135 = vadd.xlane.f32.xlu0 %v3134_v23  ;;  %v3326_v5 = vsel %vm1584_vm4, %v3324_v7, %v3312_v57  ;;  %v3565_v23 = vld [vmem:[%s5378_s14 + $0x20] sm:$0xff] }
0x160f   :  { %v3805_v7 = vld [vmem:[%s5379_s15] ss:$0 sm:$0xff] }
0x1624   :  { %4428 = vrot.lane.b32.xlu0 %v5129_v41, %s4665_s6  ;;  %v3329_v41 = vld [vmem:[#allocation8] sm:$0xff] }
0x1625   :  { %v4306_v42 = vpack.c.bf16 %v3330_v39, %v3329_v41  ;;  %v3801_v39 = vld [vmem:[%s5383_s19] ss:$0 sm:$0xff] }
0x1627   :  { %4307 = vmatprep.subr.bf16.mxu0 %v4306_v42 }
0x1628   :  { %3309 = vrot.lane.b32.xlu0 %v2872_v0, %s4668_s25 }
0x168b   :  { %v3133_v24 = vpop.xlane.xlu0 %3132 }
0x168c   :  { %4496 = vrcp.f32 %v3133_v24  ;;  %v3566_v24 = vld [vmem:[%s5378_s14 + $0x28] sm:$0xff] }
0x1696   :  { %v4497_v25 = vpop.eup %4496 }
0x1697   :  { %v3138_v27 = vmul.f32 %v4497_v25, %v4493_v15  ;;  %v4330_v25 = vpack.c.bf16 %v3566_v24, %v3565_v23 }
0x1699   :  { %4168 = vmatmul.mubr.msk.f32.vlgmr.msra.gmra.mrb[32].mxu0 %vm1584_vm4, %v3138_v27 }
0x169a   :  { %4309 = vmatpush3.bf16.msra.mxu0 %v4306_v42 }
0x169b   :  { %v3136_v29 = vpop.xlane.xlu0 %3135  ;;  %4311 = vmatprep.subr.bf16.mxu0 %v4310_v43 }
0x169c   :  { %4498 = vrcp.f32 %v3136_v29 }
0x169e   :  { %4313 = vmatpush3.bf16.msra.mxu0 %v4310_v43 }
0x169f   :  { %v4429_v30 = vpop.permute.xlu0 %4428  ;;  %4323 = vmatprep.subr.bf16.mxu0 %v4322_v16 }
0x16a0   :  { %v4431_v32 = vunpack.i.h.bf16 %v4429_v30  ;;  %v4430_v35 = vunpack.i.l.bf16 %v4429_v30 }
0x16a2   :  { %v4304_v36 = vpack.c.bf16 %v4431_v32, %v4430_v35 }
0x16a3   :  { %v3310_v52 = vpop.permute.xlu0 %3309 }
0x16a4   :  { %4305 = vmatpush3.bf16.msra.mxu1 %v4304_v36  ;;  %v3325_v54 = vsel %vm1584_vm4, %v3323_v53, %v3310_v52  ;;  %v3802_v52 = vld [vmem:[%s5377_s13] ss:$0 sm:$0xff] }
0x16a6   :  { %v4499_v37 = vpop.eup %4498 }
0x16a7   :  { %v3140_v38 = vmul.f32 %v4499_v37, %v4495_v20  ;;  %v4326_v20 = vpack.c.bf16 %v3564_v22, %v3563_v21 }
0x16a9   :  { %4175 = vmatmul.mubr.msk.f32.vlgmr.msra.gmra.mrb[38].mxu1 %vm1584_vm4, %v3140_v38  ;;  %v3800_v38 = vld [vmem:[%s5382_s18] ss:$0 sm:$0xff] }
0x176c   :  { %v3216_v47 = vpop.f32.mrb[32].mxu0 }
0x176d   :  { %3317 = vrot.lane.b32.xlu0 %v3216_v47, %s4669_s24  ;;  %v4169_v48 = vpop.f32.mrb[33].mxu0 }
0x177c   :  { %v3295_v49 = vpop.f32.mrb[38].mxu1 }
0x177d   :  { %3319 = vrot.lane.b32.xlu1 %v3295_v49, %s4669_s24  ;;  %v4176_v50 = vpop.f32.mrb[39].mxu1  ;;  %v3567_v49 = vld [vmem:[%s5378_s14 + $0x30] sm:$0xff] }
0x177e   :  { %v3568_v50 = vld [vmem:[%s5378_s14 + $0x38] sm:$0xff] }
0x177f   :  { %v4334_v51 = vpack.c.bf16 %v3568_v50, %v3567_v49 }
0x17df   :  { %v3318_v46 = vpop.permute.xlu0 %3317 }
0x17e0   :  { %v3327_v55 = vsel %vm1587_vm3, %v3325_v54, %v3318_v46 }
0x17e1   :  { %4185 = vmatprep.mubr.msk.f32.mxu0 %vm157_vm0, %v3327_v55 }
0x17ef   :  { %v3320_v58 = vpop.permute.xlu1 %3319 }
0x17f0   :  { %v3328_v59 = vsel %vm1587_vm3, %v3326_v5, %v3320_v58 }
0x17f1   :  { %4186 = vmatmul.mubr.msk.f32.vlgmr.msra.gmra.mrb[34].mxu0 %vm157_vm0, %v3328_v59 }
0x17f2   :  { %4325 = vmatpush3.bf16.msra.mxu0 %v4322_v16 }
0x17f3   :  { %4327 = vmatprep.subr.bf16.mxu0 %v4326_v20 }
0x17f6   :  { %4329 = vmatpush3.bf16.msra.mxu0 %v4326_v20 }
0x17f7   :  { %4331 = vmatprep.subr.bf16.mxu0 %v4330_v25 }
0x17fa   :  { %4333 = vmatpush3.bf16.msra.mxu0 %v4330_v25 }
0x17fb   :  { %4335 = vmatprep.subr.bf16.mxu0 %v4334_v51 }
0x17fe   :  { %4337 = vmatpush3.bf16.msra.mxu0 %v4334_v51 }
0x18c4   :  { %v4187_v60 = vpop.f32.mrb[34].mxu0 }
0x18c5   :  { %v3418_v61 = vadd.f32 %v4187_v60, %v3797_v31  ;;  %v3412_v62 = vpop.f32.mrb[35].mxu0 }
0x18c6   :  { %v3413_v63 = vadd.f32 %v3797_v31, %v3412_v62 }
0x18c7   :  { %v3424_v0 = vadd.f32 %v3418_v61, %v5106_v28 }
0x18c8   :  { %v3423_v1 = vadd.f32 %v3413_v63, %v5102_v26  ;;  %v3467_v26 = vld [vmem:[#allocation10] sm:$0xff] }
0x18c9   :  { %v3428_v33 = vsel %vm157_vm0, %v3424_v0, 0.0  ;;  %v4314_v15 = vpack.c.bf16 %v3468_v14, %v3467_v26 }
0x18ca   :  { %3429 = vadd.xlane.f32.xlu1 %v3428_v33  ;;  %v3425_v2 = vsel %vm157_vm0, %v3423_v1, 0.0 }
0x18cb   :  { %3426 = vadd.xlane.f32.xlu0 %v3425_v2  ;;  %4315 = vmatprep.subr.bf16.mxu1 %v4314_v15 }
0x18cc   :  { %4317 = vmatpush3.bf16.msra.mxu1 %v4314_v15 }
0x18cd   :  { %4319 = vmatprep.subr.bf16.mxu1 %v4318_v13 }
0x18d0   :  { %4321 = vmatpush3.bf16.msra.mxu1 %v4318_v13 }
0x1957   :  { %v3430_v3 = vpop.xlane.xlu1 %3429 }
0x1958   :  { %v3432_v12 = vmul.f32 0.03125, %v3430_v3  ;;  %v3427_v4 = vpop.xlane.xlu0 %3426 }
0x1959   :  { %v3431_v6 = vmul.f32 0.03125, %v3427_v4 }
0x195a   :  { %v3434_v9 = vsub.f32 %v3424_v0, %v3432_v12 }
0x195b   :  { %v3433_v34 = vsub.f32 %v3423_v1, %v3431_v6 }
0x195c   :  { %v3436_v11 = vmul.f32 %v3434_v9, %v3434_v9 }
0x195d   :  { %v3435_v10 = vmul.f32 %v3433_v34, %v3433_v34 }
0x195e   :  { %v3440_v28 = vsel %vm157_vm0, %v3436_v11, 0.0 }
0x195f   :  { %v3437_v8 = vsel %vm157_vm0, %v3435_v10, 0.0 }
0x1960   :  { %3438 = vadd.xlane.f32.xlu0 %v3437_v8 }
0x1964   :  { %3441 = vadd.xlane.f32.xlu0 %v3440_v28 }
0x19ed   :  { %v3439_v27 = vpop.xlane.xlu0 %3438 }
0x19ee   :  { %v3443_v29 = vmul.f32 0.03125, %v3439_v27 }
0x19f0   :  { %v3445_v30 = vadd.f32 1e-05, %v3443_v29 }
0x19f1   :  { %v3442_v32 = vpop.xlane.xlu0 %3441 }
0x19f2   :  { %4500 = vrsqrt.f32 %v3445_v30  ;;  %v3444_v35 = vmul.f32 0.03125, %v3442_v32 }
0x19f4   :  { %v3446_v36 = vadd.f32 1e-05, %v3444_v35 }
0x19f6   :  { %4502 = vrsqrt.f32 %v3446_v36 }
0x19fc   :  { %v4501_v37 = vpop.eup %4500 }
0x19fd   :  { %v3449_v41 = vmul.f32 %v4501_v37, %v3433_v34 }
0x19ff   :  { %v3457_v44 = vmul.f32 %v3800_v38, %v3449_v41 }
0x1a00   :  { %v4503_v42 = vpop.eup %4502 }
0x1a01   :  { %v3450_v45 = vmul.f32 %v4503_v42, %v3434_v9  ;;  %v3465_v43 = vadd.f32 %v3801_v39, %v3457_v44 }
0x1a03   :  { %v3458_v47 = vmul.f32 %v3800_v38, %v3450_v45  ;;  %4196 = vmatprep.mubr.msk.f32.mxu1 %vm157_vm0, %v3465_v43 }
0x1a05   :  { %v3466_v48 = vadd.f32 %v3801_v39, %v3458_v47 }
0x1a07   :  { %4197 = vmatmul.mubr.msk.f32.vlgmr.msra.gmra.mrb[40].mxu1 %vm157_vm0, %v3466_v48 }
0x1ada   :  { %v4198_v53 = vpop.f32.mrb[40].mxu1 }
0x1adb   :  { %v3556_v54 = vadd.f32 %v4198_v53, %v3802_v52  ;;  %v3550_v46 = vpop.f32.mrb[41].mxu1 }
0x1adc   :  { %v3551_v55 = vadd.f32 %v3802_v52, %v3550_v46 }
0x1add   :  { %v3560_v57 = vmax.f32 %v3556_v54, 0.0 }
0x1ade   :  { %v3559_v56 = vmax.f32 %v3551_v55, 0.0 }
0x1ae0   :  { %4215 = vmatprep.mubr.msk.f32.mxu0 %vm3576_vm6, %v3559_v56 }
0x1ae1   :  { %4216 = vmatmul.mubr.msk.f32.vlgmr.msra.gmra.mrb[36].mxu0 %vm3576_vm6, %v3560_v57 }
0x1bb4   :  { %v4217_v5 = vpop.f32.mrb[36].mxu0 }
0x1bb5   :  { %v3655_v58 = vadd.f32 %v4217_v5, %v3805_v7  ;;  %v3649_v59 = vpop.f32.mrb[37].mxu0 }
0x1bb6   :  { %v3650_v31 = vadd.f32 %v3805_v7, %v3649_v59 }
0x1bb7   :  { %v3661_v60 = vadd.f32 %v3655_v58, %v3466_v48 }
0x1bb8   :  { %v3660_v61 = vadd.f32 %v3650_v31, %v3465_v43 }
0x1bb9   :  { %v3665_v62 = vsel %vm157_vm0, %v3661_v60, 0.0 }
0x1bba   :  { %3666 = vadd.xlane.f32.xlu0 %v3665_v62  ;;  %v3662_v63 = vsel %vm157_vm0, %v3660_v61, 0.0 }
0x1bbb   :  { %3663 = vadd.xlane.f32.xlu1 %v3662_v63 }
0x1c47   :  { %v3667_v0 = vpop.xlane.xlu0 %3666 }
0x1c48   :  { %v3669_v1 = vmul.f32 0.03125, %v3667_v0  ;;  %v3664_v33 = vpop.xlane.xlu1 %3663 }
0x1c49   :  { %v3668_v2 = vmul.f32 0.03125, %v3664_v33 }
0x1c4a   :  { %v3671_v3 = vsub.f32 %v3661_v60, %v3669_v1 }
0x1c4b   :  { %v3670_v12 = vsub.f32 %v3660_v61, %v3668_v2 }
0x1c4c   :  { %v3673_v4 = vmul.f32 %v3671_v3, %v3671_v3 }
0x1c4d   :  { %v3672_v6 = vmul.f32 %v3670_v12, %v3670_v12 }
0x1c4e   :  { %v3677_v9 = vsel %vm157_vm0, %v3673_v4, 0.0 }
0x1c4f   :  { %3678 = vadd.xlane.f32.xlu0 %v3677_v9  ;;  %v3674_v34 = vsel %vm157_vm0, %v3672_v6, 0.0 }
0x1c50   :  { %3675 = vadd.xlane.f32.xlu1 %v3674_v34 }
0x1cdc   :  { %v3679_v10 = vpop.xlane.xlu0 %3678 }
0x1cdd   :  { %v3681_v8 = vmul.f32 0.03125, %v3679_v10  ;;  %v3676_v11 = vpop.xlane.xlu1 %3675 }
0x1cde   :  { %v3680_v28 = vmul.f32 0.03125, %v3676_v11 }
0x1cdf   :  { %v3683_v26 = vadd.f32 1e-05, %v3681_v8 }
0x1ce0   :  { %v3682_v14 = vadd.f32 1e-05, %v3680_v28 }
0x1ce1   :  { %4504 = vrsqrt.f32 %v3683_v26 }
0x1ce2   :  { %4506 = vrsqrt.f32 %v3682_v14 }
0x1ceb   :  { %v4505_v15 = vpop.eup %4504 }
0x1cec   :  { %v4507_v18 = vpop.eup %4506  ;;  %v3687_v13 = vmul.f32 %v4505_v15, %v3671_v3 }
0x1ced   :  { %v3686_v19 = vmul.f32 %v4507_v18, %v3670_v12 }
0x1cee   :  { %v3695_v21 = vmul.f32 %v3808_v17, %v3687_v13 }
0x1cef   :  { %v3694_v16 = vmul.f32 %v3808_v17, %v3686_v19 }
0x1cf0   :  { %v3703_v22 = vadd.f32 %v3809_v40, %v3695_v21 }
0x1cf1   :  { %v3702_v20 = vadd.f32 %v3809_v40, %v3694_v16 }
0x1cf2   :  { %3705 = vst.msk [vmem:[#allocation11 + $0x8] sm:$0xff] %vm157_vm0, %v3703_v22 }
0x1cf3   :  { %3704 = vst.msk [vmem:[#allocation11] sm:$0xff] %vm157_vm0, %v3702_v20 }
0x1cf4   :  { %4629 = shalt.err (!%p4626_p2)
}
0x1cf5   :  { %s5412_s6 = sld [smem:[#allocation24_spill]] }
0x1cfb   :  { %s4630_s29 = scalar_lea.hbm %s5412_s6, 256 }
0x1cfc   :  { %p4631_p3 = scmp.ne.s32.totalorder %s5412_s6, %s4630_s29  ;;  %p4634_p4 = scmp.lt.u32.totalorder %s4630_s29, %s5412_s6 }
0x1cfe   :  { %p4636_p5 = pnand %p4634_p4, %p4631_p3 }
0x1d00   :  { %4639 = shalt.err (!%p4636_p5)
}
0x1d01   :  { %3717 = dma.vmem_to_hbm [thread:$0]  %s3712_s4, 256, %s5412_s6, [#allocation4], %s4650_s2, %s4650_s2, %s4651_s27  }
0x1d02   :  { %4646 = dma.done.wait [#allocation4], 256  }
0x1d03   :  { %4647 = vsyncadd [#allocation4], 4294967040 }
0x1d04   :  { %3721 = vsyncpa [#allocation3], 1 }
0x1d05   :  { %3722 = vsyncpa [#allocation6], 1 }
0x1d06   :  { %3723 = vsyncpa [#allocation9], 1 }
0x1d07   :  { %3724 = vsyncpa [#allocation4], 1 }

</bundles_post_ra>
